<compile_context>
chip_gen: v7x
topology: tpu7x:2x2x1
jax: 0.10.0
libtpu: 0.0.40
codegen_flags: <defaults>
</compile_context>

<pallas_src>
import functools
import math

import jax
import jax.numpy as jnp
from jax.experimental import pallas as pl
from jax.experimental.pallas import tpu as pltpu


# ----------------------------------------------------------------------------
# Pallas kernel: lane-dense fused GEMM   out = relu?(W @ X + b)
#   W : (C_out, K)   resident across the grid
#   X : (K, M)       M = batch*Ho*Wo on the lane axis
#   b : (C_out, 1)
# ----------------------------------------------------------------------------
def _wxb_kernel(w_ref, x_ref, b_ref, o_ref, *, apply_relu):
    acc = jnp.dot(w_ref[...], x_ref[...], preferred_element_type=jnp.float32)
    acc = acc + b_ref[...]                       # (C_out, 1) broadcasts over lanes
    if apply_relu:
        acc = jnp.maximum(acc, 0.0)
    o_ref[...] = acc.astype(o_ref.dtype)


def pallas_matmul_t(w, x, bias=None, relu=False, use_bf16=True):
    """out = relu?(w @ x + bias);  w:(Cout,K)  x:(K,M)  bias:(Cout,) -> (Cout,M)."""
    w = jnp.asarray(w)
    x = jnp.asarray(x)
    Cout, K = w.shape
    K2, M = x.shape
    assert K == K2, (w.shape, x.shape)

    in_dtype = jnp.bfloat16 if use_bf16 else jnp.float32
    w = w.astype(in_dtype)
    x = x.astype(in_dtype)
    if bias is None:
        bias = jnp.zeros((Cout,), jnp.float32)
    b2 = bias.reshape(Cout, 1).astype(jnp.float32)

    if M % 128 == 0:
        tile_m = next(t for t in (512, 256, 128) if M % t == 0)
    else:
        tile_m = M            # single full-extent block; no host-side padding
    grid_m = M // tile_m

    out = pl.pallas_call(
        functools.partial(_wxb_kernel, apply_relu=relu),
        out_shape=jax.ShapeDtypeStruct((Cout, M), jnp.float32),
        grid=(grid_m,),
        in_specs=[
            pl.BlockSpec((Cout, K), lambda i: (0, 0)),      # W resident
            pl.BlockSpec((K, tile_m), lambda i: (0, i)),    # X tile (lane axis)
            pl.BlockSpec((Cout, 1), lambda i: (0, 0)),      # bias
        ],
        out_specs=pl.BlockSpec((Cout, tile_m), lambda i: (0, i)),
        compiler_params=pltpu.CompilerParams(
            dimension_semantics=("parallel",)),             # 2 TCs on v7x
    )(w, x, b2)
    return out


# ----------------------------------------------------------------------------
# Conv glue (plain JAX layout plumbing; GEMM goes through the Pallas kernel)
# ----------------------------------------------------------------------------
def conv2d_same_pad(x, kernel, stride):
    """Conv2dSamePad: TF-style SAME zero padding (NCHW)."""
    _, _, H, W = x.shape
    out_h = -(-H // stride)
    out_w = -(-W // stride)
    pad_h = (out_h - 1) * stride + kernel - H
    pad_w = (out_w - 1) * stride + kernel - W
    pt, pb = pad_h // 2, pad_h - pad_h // 2
    pleft, pright = pad_w // 2, pad_w - pad_w // 2
    return jnp.pad(x, ((0, 0), (0, 0), (pt, pb), (pleft, pright)))


def deconv_same_crop(x, kernel, stride):
    """ConvTranspose2dSamePad: crop so H_out = stride * H_in."""
    _, _, H, W = x.shape
    pad_h = kernel - stride
    pad_w = kernel - stride
    pt, pb = pad_h // 2, pad_h - pad_h // 2
    pleft, pright = pad_w // 2, pad_w - pad_w // 2
    return x[:, :, pt:H - pb, pleft:W - pright]


def conv2d(x, w, b, stride, relu, use_bf16=True):
    """VALID conv on (already padded) NCHW input via im2col + lane-dense Pallas GEMM.
    w: (C_out, C_in, kh, kw) — PyTorch Conv2d layout."""
    N, C, H, W = x.shape
    Cout, Cin, kh, kw = w.shape
    Ho = (H - kh) // stride + 1
    Wo = (W - kw) // stride + 1
    cols = []
    for i in range(kh):
        for j in range(kw):
            cols.append(x[:, :, i:i + stride * Ho:stride, j:j + stride * Wo:stride])
    patches = jnp.stack(cols, axis=0)                        # (kh*kw, N, C, Ho, Wo)
    # K ordered (C, kh, kw) to match w.reshape(Cout, C*kh*kw); M = N*Ho*Wo on lanes.
    xmat = patches.transpose(2, 0, 1, 3, 4).reshape(C * kh * kw, N * Ho * Wo)
    wmat = w.reshape(Cout, Cin * kh * kw)
    out = pallas_matmul_t(wmat, xmat, b, relu=relu, use_bf16=use_bf16)  # (Cout, M)
    return out.reshape(Cout, N, Ho, Wo).transpose(1, 0, 2, 3)


def _dilate(x, stride):
    if stride == 1:
        return x
    N, C, H, W = x.shape
    out = jnp.zeros((N, C, (H - 1) * stride + 1, (W - 1) * stride + 1), x.dtype)
    return out.at[:, :, ::stride, ::stride].set(x)


def _tconv_weight_as_conv(w):
    """ConvTranspose2d weight (C_in, C_out, kh, kw) -> equivalent Conv2d weight."""
    return jnp.flip(w, axis=(2, 3)).transpose(1, 0, 2, 3)


def conv_transpose2d(x, w, b, stride, relu):
    """PyTorch ConvTranspose2d (padding=0) as dilate+pad+flipped conv."""
    _, _, kh, kw = w.shape
    xd = _dilate(x, stride)
    xp = jnp.pad(xd, ((0, 0), (0, 0), (kh - 1, kh - 1), (kw - 1, kw - 1)))
    return conv2d(xp, _tconv_weight_as_conv(w), b, 1, relu)


# ----------------------------------------------------------------------------
# Fused Inception / Transpose-Inception: one 5x5-SAME conv GEMM for 3 branches
# ----------------------------------------------------------------------------
def _embed_5x5(w):
    k = w.shape[-1]
    p = (5 - k) // 2
    return jnp.pad(w, ((0, 0), (0, 0), (p, p), (p, p)))


def fused_inception(h, w1, w2, w3, b1, b2, b3, transposed):
    """Exactly equivalent to {1x1, 3x3, 5x5} stride-1 SAME branches + concat + ReLU
    (or the ConvTranspose + SamePad-crop variants when transposed=True)."""
    if transposed:
        w1, w2, w3 = (_tconv_weight_as_conv(w) for w in (w1, w2, w3))
    wf = jnp.concatenate([_embed_5x5(w1), _embed_5x5(w2), _embed_5x5(w3)], axis=0)
    bf = jnp.concatenate([b1, b2, b3])
    return conv2d(conv2d_same_pad(h, 5, 1), wf, bf, 1, relu=True)


# ----------------------------------------------------------------------------
# ECA block (tiny; stays in plain JAX)
# ----------------------------------------------------------------------------
def _eca_kernel_size(channel, gamma=2, bconst=1):
    t = int(abs((math.log(channel, 2) + bconst) / gamma))
    return t if t % 2 else t + 1


def eca_block(x, conv1d_w):
    """ECA: global avg pool -> 1D conv over channels -> sigmoid -> scale."""
    y = jnp.mean(x, axis=(2, 3))                 # (N, C)
    k = conv1d_w.shape[0]
    pad = k // 2
    yp = jnp.pad(y, ((0, 0), (pad, pad)))
    C = y.shape[1]
    out = sum(conv1d_w[i] * yp[:, i:i + C] for i in range(k))
    s = jax.nn.sigmoid(out)
    return x * s[:, :, None, None]


# ----------------------------------------------------------------------------
# Parameters (deterministic init, shapes from RIABConvAE_Brain.__init__)
# ----------------------------------------------------------------------------
def init_params(key, n):
    eca_k = _eca_kernel_size(24)
    specs = {
        # encoder
        'enc_conv1_w': (6, 3, 3, 3),     'enc_conv1_b': (6,),
        'enc_conv2_w': (12, 6, 3, 3),    'enc_conv2_b': (12,),
        'enc_conv3_w': (24, 12, 3, 3),   'enc_conv3_b': (24,),
        'inc_b1_w': (8, 24, 1, 1),       'inc_b1_b': (8,),
        'inc_b2_w': (8, 24, 3, 3),       'inc_b2_b': (8,),
        'inc_b3_w': (8, 24, 5, 5),       'inc_b3_b': (8,),
        'eca_enc_w': (eca_k,),
        'res_conv1_w': (24, 24, 2, 2),   'res_conv1_b': (24,),
        'res_conv2_w': (24, 24, 3, 3),   'res_conv2_b': (24,),
        'enc_conv4_w': (16, 24, 3, 3),   'enc_conv4_b': (16,),
        # decoder (ConvTranspose2d weight layout: (C_in, C_out, kh, kw))
        'dec_deconv1_w': (16, 24, 3, 3), 'dec_deconv1_b': (24,),
        'tres_conv1_w': (24, 24, 3, 3),  'tres_conv1_b': (24,),
        'tres_conv2_w': (24, 24, 2, 2),  'tres_conv2_b': (24,),
        'tinc_b1_w': (24, 8, 1, 1),      'tinc_b1_b': (8,),
        'tinc_b2_w': (24, 8, 3, 3),      'tinc_b2_b': (8,),
        'tinc_b3_w': (24, 8, 5, 5),      'tinc_b3_b': (8,),
        'eca_dec_w': (eca_k,),
        'dec_deconv2_w': (24, 12, 3, 3), 'dec_deconv2_b': (12,),
        'dec_deconv3_w': (12, 6, 3, 3),  'dec_deconv3_b': (6,),
        'dec_deconv4_w': (6, 3, 3, 3),   'dec_deconv4_b': (3,),
    }
    params = {}
    keys = jax.random.split(key, len(specs))
    for (name, shape), k in zip(specs.items(), keys):
        if name.endswith('_b'):
            params[name] = jnp.zeros(shape, jnp.float32)
        else:
            fan = int(math.prod(shape[1:])) if len(shape) > 1 else int(shape[0])
            std = (2.0 / max(fan, 1)) ** 0.5
            params[name] = std * jax.random.normal(k, shape, jnp.float32)
    # SelfExpression.Coefficient = 1e-8 * ones(n, n)  (exactly as in __init__)
    params['coefficient'] = 1e-8 * jnp.ones((n, n), jnp.float32)
    return params


# ----------------------------------------------------------------------------
# Full forward: x -> (x_recon, z, z_recon)
# ----------------------------------------------------------------------------
def riabnet_forward(params, x):
    n = x.shape[0]

    # ---------------- encoder ----------------
    h = conv2d(conv2d_same_pad(x, 3, 2), params['enc_conv1_w'], params['enc_conv1_b'], 2, relu=True)
    h = conv2d(conv2d_same_pad(h, 3, 2), params['enc_conv2_w'], params['enc_conv2_b'], 2, relu=True)
    h = conv2d(conv2d_same_pad(h, 3, 2), params['enc_conv3_w'], params['enc_conv3_b'], 2, relu=True)

    # Inception block: 1x1/3x3/5x5 SAME branches fused into one GEMM (+ReLU in-kernel)
    h = fused_inception(h,
                        params['inc_b1_w'], params['inc_b2_w'], params['inc_b3_w'],
                        params['inc_b1_b'], params['inc_b2_b'], params['inc_b3_b'],
                        transposed=False)

    # ECA block
    h = eca_block(h, params['eca_enc_w'])

    # ResNet block (kernels 2 and 3, SAME, stride 1, residual + ReLU)
    r = conv2d(conv2d_same_pad(h, 2, 1), params['res_conv1_w'], params['res_conv1_b'], 1, relu=True)
    r = conv2d(conv2d_same_pad(r, 3, 1), params['res_conv2_w'], params['res_conv2_b'], 1, relu=False)
    h = jax.nn.relu(h + r)

    # final encoder conv
    z_map = conv2d(conv2d_same_pad(h, 3, 2), params['enc_conv4_w'], params['enc_conv4_b'], 2, relu=True)

    # ---------------- self-expression ----------------
    shape = z_map.shape
    z = z_map.reshape(n, -1)
    # kept f32 for numerical fidelity with the PyTorch reference
    z_recon = pallas_matmul_t(params['coefficient'], z, None, relu=False, use_bf16=False)
    zr = z_recon.reshape(shape)

    # ---------------- decoder ----------------
    d = conv_transpose2d(zr, params['dec_deconv1_w'], params['dec_deconv1_b'], 2, relu=True)
    d = deconv_same_crop(d, 3, 2)

    # Transpose ResNet block (kernels 3 and 2, stride 1)
    r = conv_transpose2d(d, params['tres_conv1_w'], params['tres_conv1_b'], 1, relu=True)
    r = deconv_same_crop(r, 3, 1)
    r = conv_transpose2d(r, params['tres_conv2_w'], params['tres_conv2_b'], 1, relu=False)
    r = deconv_same_crop(r, 2, 1)
    d = jax.nn.relu(d + r)

    # Transpose Inception block fused into one GEMM (+ReLU in-kernel)
    d = fused_inception(d,
                        params['tinc_b1_w'], params['tinc_b2_w'], params['tinc_b3_w'],
                        params['tinc_b1_b'], params['tinc_b2_b'], params['tinc_b3_b'],
                        transposed=True)

    # ECA block
    d = eca_block(d, params['eca_dec_w'])

    # upsampling deconv stack
    d = deconv_same_crop(conv_transpose2d(d, params['dec_deconv2_w'], params['dec_deconv2_b'], 2, relu=True), 3, 2)
    d = deconv_same_crop(conv_transpose2d(d, params['dec_deconv3_w'], params['dec_deconv3_b'], 2, relu=True), 3, 2)
    x_recon = deconv_same_crop(conv_transpose2d(d, params['dec_deconv4_w'], params['dec_deconv4_b'], 2, relu=True), 3, 2)

    return x_recon, z, z_recon


# ----------------------------------------------------------------------------
if __name__ == "__main__":
    key = jax.random.PRNGKey(0)
    k_x, k_p = jax.random.split(key)

    num_sample = 2                              # n == batch size (self-expression over samples)
    x = jax.random.normal(k_x, (num_sample, 3, 16, 16), jnp.float32)
    params = init_params(k_p, num_sample)

    fwd = jax.jit(riabnet_forward)
    x_recon, z, z_recon = fwd(params, x)
    jax.block_until_ready((x_recon, z, z_recon))

    assert x_recon.shape == x.shape, x_recon.shape
    assert z.shape == (num_sample, 16), z.shape
    assert z_recon.shape == z.shape, z_recon.shape
    assert bool(jnp.all(jnp.isfinite(x_recon))) and bool(jnp.all(jnp.isfinite(z_recon)))
    print("KERNEL_OK")
</pallas_src>

<mosaic_0001>
module attributes {stable_mosaic.version = 11 : i64} {
  func.func @_wxb_kernel(%arg0: i32, %arg1: memref<6x27xbf16, #tpu.memory_space<vmem>>, %arg2: memref<27x128xbf16, #tpu.memory_space<vmem>>, %arg3: memref<6x1xf32, #tpu.memory_space<vmem>>, %arg4: memref<6x128xf32, #tpu.memory_space<vmem>>) attributes {dimension_semantics = [#tpu.dimension_semantics<parallel>], iteration_bounds = array<i64: 1>, scalar_prefetch = 0 : i64, scratch_operands = 0 : i64, tpu.core_type = #tpu.core_type<tc>, window_params = [{pipeline_mode = #tpu.pipeline_mode<synchronous>, transform_indices = @transform_0, window_bounds = array<i64: 6, 27>}, {transform_indices = @transform_1, window_bounds = array<i64: 27, 128>}, {pipeline_mode = #tpu.pipeline_mode<synchronous>, transform_indices = @transform_2, window_bounds = array<i64: 6, 1>}, {transform_indices = @transform_3, window_bounds = array<i64: 6, 128>}]} {
    %c0 = arith.constant 0 : index
    %c0_0 = arith.constant 0 : index
    %0 = vector.load %arg1[%c0, %c0_0] : memref<6x27xbf16, #tpu.memory_space<vmem>>, vector<6x27xbf16>
    %c0_1 = arith.constant 0 : index
    %c0_2 = arith.constant 0 : index
    %1 = vector.load %arg2[%c0_1, %c0_2] : memref<27x128xbf16, #tpu.memory_space<vmem>>, vector<27x128xbf16>
    %cst = arith.constant dense<0.000000e+00> : vector<6x128xf32>
    %2 = tpu.matmul %0, %1, %cst {dimension_numbers = #tpu.dot_dimension_numbers<[1], [0], [0], [1], [0, 0, 1, 1], [], []>} : vector<6x27xbf16>, vector<27x128xbf16>, vector<6x128xf32> -> vector<6x128xf32>
    %c0_3 = arith.constant 0 : index
    %c0_4 = arith.constant 0 : index
    %3 = vector.load %arg3[%c0_3, %c0_4] : memref<6x1xf32, #tpu.memory_space<vmem>>, vector<6x1xf32>
    %4 = vector.broadcast %3 : vector<6x1xf32> to vector<6x128xf32>
    %5 = arith.addf %2, %4 : vector<6x128xf32>
    %cst_5 = arith.constant 0.000000e+00 : f32
    %6 = vector.broadcast %cst_5 : f32 to vector<6x128xf32>
    %7 = arith.maximumf %5, %6 : vector<6x128xf32>
    %c0_6 = arith.constant 0 : index
    %c0_7 = arith.constant 0 : index
    %8 = vector.load %arg4[%c0_6, %c0_7] : memref<6x128xf32, #tpu.memory_space<vmem>>, vector<6x128xf32>
    tpu.vector_store %arg4[%c0_6, %c0_7], %7 {strides = array<i32>} : memref<6x128xf32, #tpu.memory_space<vmem>>, vector<6x128xf32>,
    return
  }
  func.func @transform_0(%arg0: i32) -> (i32, i32) {
    %c0_i32 = arith.constant 0 : i32
    %c0_i32_0 = arith.constant 0 : i32
    %c0_i32_1 = arith.constant 0 : i32
    return %c0_i32, %c0_i32_0 : i32, i32
  }
  func.func @transform_1(%arg0: i32) -> (i32, i32) {
    %c0_i32 = arith.constant 0 : i32
    %c0_i32_0 = arith.constant 0 : i32
    return %c0_i32, %arg0 : i32, i32
  }
  func.func @transform_2(%arg0: i32) -> (i32, i32) {
    %c0_i32 = arith.constant 0 : i32
    %c0_i32_0 = arith.constant 0 : i32
    %c0_i32_1 = arith.constant 0 : i32
    return %c0_i32, %c0_i32_0 : i32, i32
  }
  func.func @transform_3(%arg0: i32) -> (i32, i32) {
    %c0_i32 = arith.constant 0 : i32
    %c0_i32_0 = arith.constant 0 : i32
    return %c0_i32, %arg0 : i32, i32
  }
}

module attributes {stable_mosaic.version = 11 : i64} {
  func.func @_wxb_kernel(%arg0: i32, %arg1: memref<12x54xbf16, #tpu.memory_space<vmem>>, %arg2: memref<54x32xbf16, #tpu.memory_space<vmem>>, %arg3: memref<12x1xf32, #tpu.memory_space<vmem>>, %arg4: memref<12x32xf32, #tpu.memory_space<vmem>>) attributes {dimension_semantics = [#tpu.dimension_semantics<parallel>], iteration_bounds = array<i64: 1>, scalar_prefetch = 0 : i64, scratch_operands = 0 : i64, tpu.core_type = #tpu.core_type<tc>, window_params = [{pipeline_mode = #tpu.pipeline_mode<synchronous>, transform_indices = @transform_0, window_bounds = array<i64: 12, 54>}, {transform_indices = @transform_1, window_bounds = array<i64: 54, 32>}, {pipeline_mode = #tpu.pipeline_mode<synchronous>, transform_indices = @transform_2, window_bounds = array<i64: 12, 1>}, {transform_indices = @transform_3, window_bounds = array<i64: 12, 32>}]} {
    %c0 = arith.constant 0 : index
    %c0_0 = arith.constant 0 : index
    %0 = vector.load %arg1[%c0, %c0_0] : memref<12x54xbf16, #tpu.memory_space<vmem>>, vector<12x54xbf16>
    %c0_1 = arith.constant 0 : index
    %c0_2 = arith.constant 0 : index
    %1 = vector.load %arg2[%c0_1, %c0_2] : memref<54x32xbf16, #tpu.memory_space<vmem>>, vector<54x32xbf16>
    %cst = arith.constant dense<0.000000e+00> : vector<12x32xf32>
    %2 = tpu.matmul %0, %1, %cst {dimension_numbers = #tpu.dot_dimension_numbers<[1], [0], [0], [1], [0, 0, 1, 1], [], []>} : vector<12x54xbf16>, vector<54x32xbf16>, vector<12x32xf32> -> vector<12x32xf32>
    %c0_3 = arith.constant 0 : index
    %c0_4 = arith.constant 0 : index
    %3 = vector.load %arg3[%c0_3, %c0_4] : memref<12x1xf32, #tpu.memory_space<vmem>>, vector<12x1xf32>
    %4 = vector.broadcast %3 : vector<12x1xf32> to vector<12x32xf32>
    %5 = arith.addf %2, %4 : vector<12x32xf32>
    %cst_5 = arith.constant 0.000000e+00 : f32
    %6 = vector.broadcast %cst_5 : f32 to vector<12x32xf32>
    %7 = arith.maximumf %5, %6 : vector<12x32xf32>
    %c0_6 = arith.constant 0 : index
    %c0_7 = arith.constant 0 : index
    %8 = vector.load %arg4[%c0_6, %c0_7] : memref<12x32xf32, #tpu.memory_space<vmem>>, vector<12x32xf32>
    tpu.vector_store %arg4[%c0_6, %c0_7], %7 {strides = array<i32>} : memref<12x32xf32, #tpu.memory_space<vmem>>, vector<12x32xf32>,
    return
  }
  func.func @transform_0(%arg0: i32) -> (i32, i32) {
    %c0_i32 = arith.constant 0 : i32
    %c0_i32_0 = arith.constant 0 : i32
    %c0_i32_1 = arith.constant 0 : i32
    return %c0_i32, %c0_i32_0 : i32, i32
  }
  func.func @transform_1(%arg0: i32) -> (i32, i32) {
    %c0_i32 = arith.constant 0 : i32
    %c0_i32_0 = arith.constant 0 : i32
    return %c0_i32, %arg0 : i32, i32
  }
  func.func @transform_2(%arg0: i32) -> (i32, i32) {
    %c0_i32 = arith.constant 0 : i32
    %c0_i32_0 = arith.constant 0 : i32
    %c0_i32_1 = arith.constant 0 : i32
    return %c0_i32, %c0_i32_0 : i32, i32
  }
  func.func @transform_3(%arg0: i32) -> (i32, i32) {
    %c0_i32 = arith.constant 0 : i32
    %c0_i32_0 = arith.constant 0 : i32
    return %c0_i32, %arg0 : i32, i32
  }
}

module attributes {stable_mosaic.version = 11 : i64} {
  func.func @_wxb_kernel(%arg0: i32, %arg1: memref<24x108xbf16, #tpu.memory_space<vmem>>, %arg2: memref<108x8xbf16, #tpu.memory_space<vmem>>, %arg3: memref<24x1xf32, #tpu.memory_space<vmem>>, %arg4: memref<24x8xf32, #tpu.memory_space<vmem>>) attributes {dimension_semantics = [#tpu.dimension_semantics<parallel>], iteration_bounds = array<i64: 1>, scalar_prefetch = 0 : i64, scratch_operands = 0 : i64, tpu.core_type = #tpu.core_type<tc>, window_params = [{pipeline_mode = #tpu.pipeline_mode<synchronous>, transform_indices = @transform_0, window_bounds = array<i64: 24, 108>}, {transform_indices = @transform_1, window_bounds = array<i64: 108, 8>}, {pipeline_mode = #tpu.pipeline_mode<synchronous>, transform_indices = @transform_2, window_bounds = array<i64: 24, 1>}, {transform_indices = @transform_3, window_bounds = array<i64: 24, 8>}]} {
    %c0 = arith.constant 0 : index
    %c0_0 = arith.constant 0 : index
    %0 = vector.load %arg1[%c0, %c0_0] : memref<24x108xbf16, #tpu.memory_space<vmem>>, vector<24x108xbf16>
    %c0_1 = arith.constant 0 : index
    %c0_2 = arith.constant 0 : index
    %1 = vector.load %arg2[%c0_1, %c0_2] : memref<108x8xbf16, #tpu.memory_space<vmem>>, vector<108x8xbf16>
    %cst = arith.constant dense<0.000000e+00> : vector<24x8xf32>
    %2 = tpu.matmul %0, %1, %cst {dimension_numbers = #tpu.dot_dimension_numbers<[1], [0], [0], [1], [0, 0, 1, 1], [], []>} : vector<24x108xbf16>, vector<108x8xbf16>, vector<24x8xf32> -> vector<24x8xf32>
    %c0_3 = arith.constant 0 : index
    %c0_4 = arith.constant 0 : index
    %3 = vector.load %arg3[%c0_3, %c0_4] : memref<24x1xf32, #tpu.memory_space<vmem>>, vector<24x1xf32>
    %4 = vector.broadcast %3 : vector<24x1xf32> to vector<24x8xf32>
    %5 = arith.addf %2, %4 : vector<24x8xf32>
    %cst_5 = arith.constant 0.000000e+00 : f32
    %6 = vector.broadcast %cst_5 : f32 to vector<24x8xf32>
    %7 = arith.maximumf %5, %6 : vector<24x8xf32>
    %c0_6 = arith.constant 0 : index
    %c0_7 = arith.constant 0 : index
    %8 = vector.load %arg4[%c0_6, %c0_7] : memref<24x8xf32, #tpu.memory_space<vmem>>, vector<24x8xf32>
    tpu.vector_store %arg4[%c0_6, %c0_7], %7 {strides = array<i32>} : memref<24x8xf32, #tpu.memory_space<vmem>>, vector<24x8xf32>,
    return
  }
  func.func @transform_0(%arg0: i32) -> (i32, i32) {
    %c0_i32 = arith.constant 0 : i32
    %c0_i32_0 = arith.constant 0 : i32
    %c0_i32_1 = arith.constant 0 : i32
    return %c0_i32, %c0_i32_0 : i32, i32
  }
  func.func @transform_1(%arg0: i32) -> (i32, i32) {
    %c0_i32 = arith.constant 0 : i32
    %c0_i32_0 = arith.constant 0 : i32
    return %c0_i32, %arg0 : i32, i32
  }
  func.func @transform_2(%arg0: i32) -> (i32, i32) {
    %c0_i32 = arith.constant 0 : i32
    %c0_i32_0 = arith.constant 0 : i32
    %c0_i32_1 = arith.constant 0 : i32
    return %c0_i32, %c0_i32_0 : i32, i32
  }
  func.func @transform_3(%arg0: i32) -> (i32, i32) {
    %c0_i32 = arith.constant 0 : i32
    %c0_i32_0 = arith.constant 0 : i32
    return %c0_i32, %arg0 : i32, i32
  }
}

module attributes {stable_mosaic.version = 11 : i64} {
  func.func @_wxb_kernel(%arg0: i32, %arg1: memref<24x600xbf16, #tpu.memory_space<vmem>>, %arg2: memref<600x8xbf16, #tpu.memory_space<vmem>>, %arg3: memref<24x1xf32, #tpu.memory_space<vmem>>, %arg4: memref<24x8xf32, #tpu.memory_space<vmem>>) attributes {dimension_semantics = [#tpu.dimension_semantics<parallel>], iteration_bounds = array<i64: 1>, scalar_prefetch = 0 : i64, scratch_operands = 0 : i64, tpu.core_type = #tpu.core_type<tc>, window_params = [{pipeline_mode = #tpu.pipeline_mode<synchronous>, transform_indices = @transform_0, window_bounds = array<i64: 24, 600>}, {transform_indices = @transform_1, window_bounds = array<i64: 600, 8>}, {pipeline_mode = #tpu.pipeline_mode<synchronous>, transform_indices = @transform_2, window_bounds = array<i64: 24, 1>}, {transform_indices = @transform_3, window_bounds = array<i64: 24, 8>}]} {
    %c0 = arith.constant 0 : index
    %c0_0 = arith.constant 0 : index
    %0 = vector.load %arg1[%c0, %c0_0] : memref<24x600xbf16, #tpu.memory_space<vmem>>, vector<24x600xbf16>
    %c0_1 = arith.constant 0 : index
    %c0_2 = arith.constant 0 : index
    %1 = vector.load %arg2[%c0_1, %c0_2] : memref<600x8xbf16, #tpu.memory_space<vmem>>, vector<600x8xbf16>
    %cst = arith.constant dense<0.000000e+00> : vector<24x8xf32>
    %2 = tpu.matmul %0, %1, %cst {dimension_numbers = #tpu.dot_dimension_numbers<[1], [0], [0], [1], [0, 0, 1, 1], [], []>} : vector<24x600xbf16>, vector<600x8xbf16>, vector<24x8xf32> -> vector<24x8xf32>
    %c0_3 = arith.constant 0 : index
    %c0_4 = arith.constant 0 : index
    %3 = vector.load %arg3[%c0_3, %c0_4] : memref<24x1xf32, #tpu.memory_space<vmem>>, vector<24x1xf32>
    %4 = vector.broadcast %3 : vector<24x1xf32> to vector<24x8xf32>
    %5 = arith.addf %2, %4 : vector<24x8xf32>
    %cst_5 = arith.constant 0.000000e+00 : f32
    %6 = vector.broadcast %cst_5 : f32 to vector<24x8xf32>
    %7 = arith.maximumf %5, %6 : vector<24x8xf32>
    %c0_6 = arith.constant 0 : index
    %c0_7 = arith.constant 0 : index
    %8 = vector.load %arg4[%c0_6, %c0_7] : memref<24x8xf32, #tpu.memory_space<vmem>>, vector<24x8xf32>
    tpu.vector_store %arg4[%c0_6, %c0_7], %7 {strides = array<i32>} : memref<24x8xf32, #tpu.memory_space<vmem>>, vector<24x8xf32>,
    return
  }
  func.func @transform_0(%arg0: i32) -> (i32, i32) {
    %c0_i32 = arith.constant 0 : i32
    %c0_i32_0 = arith.constant 0 : i32
    %c0_i32_1 = arith.constant 0 : i32
    return %c0_i32, %c0_i32_0 : i32, i32
  }
  func.func @transform_1(%arg0: i32) -> (i32, i32) {
    %c0_i32 = arith.constant 0 : i32
    %c0_i32_0 = arith.constant 0 : i32
    return %c0_i32, %arg0 : i32, i32
  }
  func.func @transform_2(%arg0: i32) -> (i32, i32) {
    %c0_i32 = arith.constant 0 : i32
    %c0_i32_0 = arith.constant 0 : i32
    %c0_i32_1 = arith.constant 0 : i32
    return %c0_i32, %c0_i32_0 : i32, i32
  }
  func.func @transform_3(%arg0: i32) -> (i32, i32) {
    %c0_i32 = arith.constant 0 : i32
    %c0_i32_0 = arith.constant 0 : i32
    return %c0_i32, %arg0 : i32, i32
  }
}

module attributes {stable_mosaic.version = 11 : i64} {
  func.func @_wxb_kernel(%arg0: i32, %arg1: memref<24x96xbf16, #tpu.memory_space<vmem>>, %arg2: memref<96x8xbf16, #tpu.memory_space<vmem>>, %arg3: memref<24x1xf32, #tpu.memory_space<vmem>>, %arg4: memref<24x8xf32, #tpu.memory_space<vmem>>) attributes {dimension_semantics = [#tpu.dimension_semantics<parallel>], iteration_bounds = array<i64: 1>, scalar_prefetch = 0 : i64, scratch_operands = 0 : i64, tpu.core_type = #tpu.core_type<tc>, window_params = [{pipeline_mode = #tpu.pipeline_mode<synchronous>, transform_indices = @transform_0, window_bounds = array<i64: 24, 96>}, {transform_indices = @transform_1, window_bounds = array<i64: 96, 8>}, {pipeline_mode = #tpu.pipeline_mode<synchronous>, transform_indices = @transform_2, window_bounds = array<i64: 24, 1>}, {transform_indices = @transform_3, window_bounds = array<i64: 24, 8>}]} {
    %c0 = arith.constant 0 : index
    %c0_0 = arith.constant 0 : index
    %0 = vector.load %arg1[%c0, %c0_0] : memref<24x96xbf16, #tpu.memory_space<vmem>>, vector<24x96xbf16>
    %c0_1 = arith.constant 0 : index
    %c0_2 = arith.constant 0 : index
    %1 = vector.load %arg2[%c0_1, %c0_2] : memref<96x8xbf16, #tpu.memory_space<vmem>>, vector<96x8xbf16>
    %cst = arith.constant dense<0.000000e+00> : vector<24x8xf32>
    %2 = tpu.matmul %0, %1, %cst {dimension_numbers = #tpu.dot_dimension_numbers<[1], [0], [0], [1], [0, 0, 1, 1], [], []>} : vector<24x96xbf16>, vector<96x8xbf16>, vector<24x8xf32> -> vector<24x8xf32>
    %c0_3 = arith.constant 0 : index
    %c0_4 = arith.constant 0 : index
    %3 = vector.load %arg3[%c0_3, %c0_4] : memref<24x1xf32, #tpu.memory_space<vmem>>, vector<24x1xf32>
    %4 = vector.broadcast %3 : vector<24x1xf32> to vector<24x8xf32>
    %5 = arith.addf %2, %4 : vector<24x8xf32>
    %cst_5 = arith.constant 0.000000e+00 : f32
    %6 = vector.broadcast %cst_5 : f32 to vector<24x8xf32>
    %7 = arith.maximumf %5, %6 : vector<24x8xf32>
    %c0_6 = arith.constant 0 : index
    %c0_7 = arith.constant 0 : index
    %8 = vector.load %arg4[%c0_6, %c0_7] : memref<24x8xf32, #tpu.memory_space<vmem>>, vector<24x8xf32>
    tpu.vector_store %arg4[%c0_6, %c0_7], %7 {strides = array<i32>} : memref<24x8xf32, #tpu.memory_space<vmem>>, vector<24x8xf32>,
    return
  }
  func.func @transform_0(%arg0: i32) -> (i32, i32) {
    %c0_i32 = arith.constant 0 : i32
    %c0_i32_0 = arith.constant 0 : i32
    %c0_i32_1 = arith.constant 0 : i32
    return %c0_i32, %c0_i32_0 : i32, i32
  }
  func.func @transform_1(%arg0: i32) -> (i32, i32) {
    %c0_i32 = arith.constant 0 : i32
    %c0_i32_0 = arith.constant 0 : i32
    return %c0_i32, %arg0 : i32, i32
  }
  func.func @transform_2(%arg0: i32) -> (i32, i32) {
    %c0_i32 = arith.constant 0 : i32
    %c0_i32_0 = arith.constant 0 : i32
    %c0_i32_1 = arith.constant 0 : i32
    return %c0_i32, %c0_i32_0 : i32, i32
  }
  func.func @transform_3(%arg0: i32) -> (i32, i32) {
    %c0_i32 = arith.constant 0 : i32
    %c0_i32_0 = arith.constant 0 : i32
    return %c0_i32, %arg0 : i32, i32
  }
}

module attributes {stable_mosaic.version = 11 : i64} {
  func.func @_wxb_kernel(%arg0: i32, %arg1: memref<24x216xbf16, #tpu.memory_space<vmem>>, %arg2: memref<216x8xbf16, #tpu.memory_space<vmem>>, %arg3: memref<24x1xf32, #tpu.memory_space<vmem>>, %arg4: memref<24x8xf32, #tpu.memory_space<vmem>>) attributes {dimension_semantics = [#tpu.dimension_semantics<parallel>], iteration_bounds = array<i64: 1>, scalar_prefetch = 0 : i64, scratch_operands = 0 : i64, tpu.core_type = #tpu.core_type<tc>, window_params = [{pipeline_mode = #tpu.pipeline_mode<synchronous>, transform_indices = @transform_0, window_bounds = array<i64: 24, 216>}, {transform_indices = @transform_1, window_bounds = array<i64: 216, 8>}, {pipeline_mode = #tpu.pipeline_mode<synchronous>, transform_indices = @transform_2, window_bounds = array<i64: 24, 1>}, {transform_indices = @transform_3, window_bounds = array<i64: 24, 8>}]} {
    %c0 = arith.constant 0 : index
    %c0_0 = arith.constant 0 : index
    %0 = vector.load %arg1[%c0, %c0_0] : memref<24x216xbf16, #tpu.memory_space<vmem>>, vector<24x216xbf16>
    %c0_1 = arith.constant 0 : index
    %c0_2 = arith.constant 0 : index
    %1 = vector.load %arg2[%c0_1, %c0_2] : memref<216x8xbf16, #tpu.memory_space<vmem>>, vector<216x8xbf16>
    %cst = arith.constant dense<0.000000e+00> : vector<24x8xf32>
    %2 = tpu.matmul %0, %1, %cst {dimension_numbers = #tpu.dot_dimension_numbers<[1], [0], [0], [1], [0, 0, 1, 1], [], []>} : vector<24x216xbf16>, vector<216x8xbf16>, vector<24x8xf32> -> vector<24x8xf32>
    %c0_3 = arith.constant 0 : index
    %c0_4 = arith.constant 0 : index
    %3 = vector.load %arg3[%c0_3, %c0_4] : memref<24x1xf32, #tpu.memory_space<vmem>>, vector<24x1xf32>
    %4 = vector.broadcast %3 : vector<24x1xf32> to vector<24x8xf32>
    %5 = arith.addf %2, %4 : vector<24x8xf32>
    %c0_5 = arith.constant 0 : index
    %c0_6 = arith.constant 0 : index
    %6 = vector.load %arg4[%c0_5, %c0_6] : memref<24x8xf32, #tpu.memory_space<vmem>>, vector<24x8xf32>
    tpu.vector_store %arg4[%c0_5, %c0_6], %5 {strides = array<i32>} : memref<24x8xf32, #tpu.memory_space<vmem>>, vector<24x8xf32>,
    return
  }
  func.func @transform_0(%arg0: i32) -> (i32, i32) {
    %c0_i32 = arith.constant 0 : i32
    %c0_i32_0 = arith.constant 0 : i32
    %c0_i32_1 = arith.constant 0 : i32
    return %c0_i32, %c0_i32_0 : i32, i32
  }
  func.func @transform_1(%arg0: i32) -> (i32, i32) {
    %c0_i32 = arith.constant 0 : i32
    %c0_i32_0 = arith.constant 0 : i32
    return %c0_i32, %arg0 : i32, i32
  }
  func.func @transform_2(%arg0: i32) -> (i32, i32) {
    %c0_i32 = arith.constant 0 : i32
    %c0_i32_0 = arith.constant 0 : i32
    %c0_i32_1 = arith.constant 0 : i32
    return %c0_i32, %c0_i32_0 : i32, i32
  }
  func.func @transform_3(%arg0: i32) -> (i32, i32) {
    %c0_i32 = arith.constant 0 : i32
    %c0_i32_0 = arith.constant 0 : i32
    return %c0_i32, %arg0 : i32, i32
  }
}

module attributes {stable_mosaic.version = 11 : i64} {
  func.func @_wxb_kernel(%arg0: i32, %arg1: memref<16x216xbf16, #tpu.memory_space<vmem>>, %arg2: memref<216x2xbf16, #tpu.memory_space<vmem>>, %arg3: memref<16x1xf32, #tpu.memory_space<vmem>>, %arg4: memref<16x2xf32, #tpu.memory_space<vmem>>) attributes {dimension_semantics = [#tpu.dimension_semantics<parallel>], iteration_bounds = array<i64: 1>, scalar_prefetch = 0 : i64, scratch_operands = 0 : i64, tpu.core_type = #tpu.core_type<tc>, window_params = [{pipeline_mode = #tpu.pipeline_mode<synchronous>, transform_indices = @transform_0, window_bounds = array<i64: 16, 216>}, {transform_indices = @transform_1, window_bounds = array<i64: 216, 2>}, {pipeline_mode = #tpu.pipeline_mode<synchronous>, transform_indices = @transform_2, window_bounds = array<i64: 16, 1>}, {transform_indices = @transform_3, window_bounds = array<i64: 16, 2>}]} {
    %c0 = arith.constant 0 : index
    %c0_0 = arith.constant 0 : index
    %0 = vector.load %arg1[%c0, %c0_0] : memref<16x216xbf16, #tpu.memory_space<vmem>>, vector<16x216xbf16>
    %c0_1 = arith.constant 0 : index
    %c0_2 = arith.constant 0 : index
    %1 = vector.load %arg2[%c0_1, %c0_2] : memref<216x2xbf16, #tpu.memory_space<vmem>>, vector<216x2xbf16>
    %cst = arith.constant dense<0.000000e+00> : vector<16x2xf32>
    %2 = tpu.matmul %0, %1, %cst {dimension_numbers = #tpu.dot_dimension_numbers<[1], [0], [0], [1], [0, 0, 1, 1], [], []>} : vector<16x216xbf16>, vector<216x2xbf16>, vector<16x2xf32> -> vector<16x2xf32>
    %c0_3 = arith.constant 0 : index
    %c0_4 = arith.constant 0 : index
    %3 = vector.load %arg3[%c0_3, %c0_4] : memref<16x1xf32, #tpu.memory_space<vmem>>, vector<16x1xf32>
    %4 = vector.broadcast %3 : vector<16x1xf32> to vector<16x2xf32>
    %5 = arith.addf %2, %4 : vector<16x2xf32>
    %cst_5 = arith.constant 0.000000e+00 : f32
    %6 = vector.broadcast %cst_5 : f32 to vector<16x2xf32>
    %7 = arith.maximumf %5, %6 : vector<16x2xf32>
    %c0_6 = arith.constant 0 : index
    %c0_7 = arith.constant 0 : index
    %8 = vector.load %arg4[%c0_6, %c0_7] : memref<16x2xf32, #tpu.memory_space<vmem>>, vector<16x2xf32>
    tpu.vector_store %arg4[%c0_6, %c0_7], %7 {strides = array<i32>} : memref<16x2xf32, #tpu.memory_space<vmem>>, vector<16x2xf32>,
    return
  }
  func.func @transform_0(%arg0: i32) -> (i32, i32) {
    %c0_i32 = arith.constant 0 : i32
    %c0_i32_0 = arith.constant 0 : i32
    %c0_i32_1 = arith.constant 0 : i32
    return %c0_i32, %c0_i32_0 : i32, i32
  }
  func.func @transform_1(%arg0: i32) -> (i32, i32) {
    %c0_i32 = arith.constant 0 : i32
    %c0_i32_0 = arith.constant 0 : i32
    return %c0_i32, %arg0 : i32, i32
  }
  func.func @transform_2(%arg0: i32) -> (i32, i32) {
    %c0_i32 = arith.constant 0 : i32
    %c0_i32_0 = arith.constant 0 : i32
    %c0_i32_1 = arith.constant 0 : i32
    return %c0_i32, %c0_i32_0 : i32, i32
  }
  func.func @transform_3(%arg0: i32) -> (i32, i32) {
    %c0_i32 = arith.constant 0 : i32
    %c0_i32_0 = arith.constant 0 : i32
    return %c0_i32, %arg0 : i32, i32
  }
}

module attributes {stable_mosaic.version = 11 : i64} {
  func.func @_wxb_kernel(%arg0: i32, %arg1: memref<2x2xf32, #tpu.memory_space<vmem>>, %arg2: memref<2x16xf32, #tpu.memory_space<vmem>>, %arg3: memref<2x1xf32, #tpu.memory_space<vmem>>, %arg4: memref<2x16xf32, #tpu.memory_space<vmem>>) attributes {dimension_semantics = [#tpu.dimension_semantics<parallel>], iteration_bounds = array<i64: 1>, scalar_prefetch = 0 : i64, scratch_operands = 0 : i64, tpu.core_type = #tpu.core_type<tc>, window_params = [{pipeline_mode = #tpu.pipeline_mode<synchronous>, transform_indices = @transform_0, window_bounds = array<i64: 2, 2>}, {transform_indices = @transform_1, window_bounds = array<i64: 2, 16>}, {pipeline_mode = #tpu.pipeline_mode<synchronous>, transform_indices = @transform_2, window_bounds = array<i64: 2, 1>}, {transform_indices = @transform_3, window_bounds = array<i64: 2, 16>}]} {
    %c0 = arith.constant 0 : index
    %c0_0 = arith.constant 0 : index
    %0 = vector.load %arg1[%c0, %c0_0] : memref<2x2xf32, #tpu.memory_space<vmem>>, vector<2x2xf32>
    %c0_1 = arith.constant 0 : index
    %c0_2 = arith.constant 0 : index
    %1 = vector.load %arg2[%c0_1, %c0_2] : memref<2x16xf32, #tpu.memory_space<vmem>>, vector<2x16xf32>
    %cst = arith.constant dense<0.000000e+00> : vector<2x16xf32>
    %2 = tpu.matmul %0, %1, %cst {dimension_numbers = #tpu.dot_dimension_numbers<[1], [0], [0], [1], [0, 0, 1, 1], [], []>} : vector<2x2xf32>, vector<2x16xf32>, vector<2x16xf32> -> vector<2x16xf32>
    %c0_3 = arith.constant 0 : index
    %c0_4 = arith.constant 0 : index
    %3 = vector.load %arg3[%c0_3, %c0_4] : memref<2x1xf32, #tpu.memory_space<vmem>>, vector<2x1xf32>
    %4 = vector.broadcast %3 : vector<2x1xf32> to vector<2x16xf32>
    %5 = arith.addf %2, %4 : vector<2x16xf32>
    %c0_5 = arith.constant 0 : index
    %c0_6 = arith.constant 0 : index
    %6 = vector.load %arg4[%c0_5, %c0_6] : memref<2x16xf32, #tpu.memory_space<vmem>>, vector<2x16xf32>
    tpu.vector_store %arg4[%c0_5, %c0_6], %5 {strides = array<i32>} : memref<2x16xf32, #tpu.memory_space<vmem>>, vector<2x16xf32>,
    return
  }
  func.func @transform_0(%arg0: i32) -> (i32, i32) {
    %c0_i32 = arith.constant 0 : i32
    %c0_i32_0 = arith.constant 0 : i32
    %c0_i32_1 = arith.constant 0 : i32
    return %c0_i32, %c0_i32_0 : i32, i32
  }
  func.func @transform_1(%arg0: i32) -> (i32, i32) {
    %c0_i32 = arith.constant 0 : i32
    %c0_i32_0 = arith.constant 0 : i32
    return %c0_i32, %arg0 : i32, i32
  }
  func.func @transform_2(%arg0: i32) -> (i32, i32) {
    %c0_i32 = arith.constant 0 : i32
    %c0_i32_0 = arith.constant 0 : i32
    %c0_i32_1 = arith.constant 0 : i32
    return %c0_i32, %c0_i32_0 : i32, i32
  }
  func.func @transform_3(%arg0: i32) -> (i32, i32) {
    %c0_i32 = arith.constant 0 : i32
    %c0_i32_0 = arith.constant 0 : i32
    return %c0_i32, %arg0 : i32, i32
  }
}

module attributes {stable_mosaic.version = 11 : i64} {
  func.func @_wxb_kernel(%arg0: i32, %arg1: memref<24x144xbf16, #tpu.memory_space<vmem>>, %arg2: memref<144x18xbf16, #tpu.memory_space<vmem>>, %arg3: memref<24x1xf32, #tpu.memory_space<vmem>>, %arg4: memref<24x18xf32, #tpu.memory_space<vmem>>) attributes {dimension_semantics = [#tpu.dimension_semantics<parallel>], iteration_bounds = array<i64: 1>, scalar_prefetch = 0 : i64, scratch_operands = 0 : i64, tpu.core_type = #tpu.core_type<tc>, window_params = [{pipeline_mode = #tpu.pipeline_mode<synchronous>, transform_indices = @transform_0, window_bounds = array<i64: 24, 144>}, {transform_indices = @transform_1, window_bounds = array<i64: 144, 18>}, {pipeline_mode = #tpu.pipeline_mode<synchronous>, transform_indices = @transform_2, window_bounds = array<i64: 24, 1>}, {transform_indices = @transform_3, window_bounds = array<i64: 24, 18>}]} {
    %c0 = arith.constant 0 : index
    %c0_0 = arith.constant 0 : index
    %0 = vector.load %arg1[%c0, %c0_0] : memref<24x144xbf16, #tpu.memory_space<vmem>>, vector<24x144xbf16>
    %c0_1 = arith.constant 0 : index
    %c0_2 = arith.constant 0 : index
    %1 = vector.load %arg2[%c0_1, %c0_2] : memref<144x18xbf16, #tpu.memory_space<vmem>>, vector<144x18xbf16>
    %cst = arith.constant dense<0.000000e+00> : vector<24x18xf32>
    %2 = tpu.matmul %0, %1, %cst {dimension_numbers = #tpu.dot_dimension_numbers<[1], [0], [0], [1], [0, 0, 1, 1], [], []>} : vector<24x144xbf16>, vector<144x18xbf16>, vector<24x18xf32> -> vector<24x18xf32>
    %c0_3 = arith.constant 0 : index
    %c0_4 = arith.constant 0 : index
    %3 = vector.load %arg3[%c0_3, %c0_4] : memref<24x1xf32, #tpu.memory_space<vmem>>, vector<24x1xf32>
    %4 = vector.broadcast %3 : vector<24x1xf32> to vector<24x18xf32>
    %5 = arith.addf %2, %4 : vector<24x18xf32>
    %cst_5 = arith.constant 0.000000e+00 : f32
    %6 = vector.broadcast %cst_5 : f32 to vector<24x18xf32>
    %7 = arith.maximumf %5, %6 : vector<24x18xf32>
    %c0_6 = arith.constant 0 : index
    %c0_7 = arith.constant 0 : index
    %8 = vector.load %arg4[%c0_6, %c0_7] : memref<24x18xf32, #tpu.memory_space<vmem>>, vector<24x18xf32>
    tpu.vector_store %arg4[%c0_6, %c0_7], %7 {strides = array<i32>} : memref<24x18xf32, #tpu.memory_space<vmem>>, vector<24x18xf32>,
    return
  }
  func.func @transform_0(%arg0: i32) -> (i32, i32) {
    %c0_i32 = arith.constant 0 : i32
    %c0_i32_0 = arith.constant 0 : i32
    %c0_i32_1 = arith.constant 0 : i32
    return %c0_i32, %c0_i32_0 : i32, i32
  }
  func.func @transform_1(%arg0: i32) -> (i32, i32) {
    %c0_i32 = arith.constant 0 : i32
    %c0_i32_0 = arith.constant 0 : i32
    return %c0_i32, %arg0 : i32, i32
  }
  func.func @transform_2(%arg0: i32) -> (i32, i32) {
    %c0_i32 = arith.constant 0 : i32
    %c0_i32_0 = arith.constant 0 : i32
    %c0_i32_1 = arith.constant 0 : i32
    return %c0_i32, %c0_i32_0 : i32, i32
  }
  func.func @transform_3(%arg0: i32) -> (i32, i32) {
    %c0_i32 = arith.constant 0 : i32
    %c0_i32_0 = arith.constant 0 : i32
    return %c0_i32, %arg0 : i32, i32
  }
}

module attributes {stable_mosaic.version = 11 : i64} {
  func.func @_wxb_kernel(%arg0: i32, %arg1: memref<24x216xbf16, #tpu.memory_space<vmem>>, %arg2: memref<216x32xbf16, #tpu.memory_space<vmem>>, %arg3: memref<24x1xf32, #tpu.memory_space<vmem>>, %arg4: memref<24x32xf32, #tpu.memory_space<vmem>>) attributes {dimension_semantics = [#tpu.dimension_semantics<parallel>], iteration_bounds = array<i64: 1>, scalar_prefetch = 0 : i64, scratch_operands = 0 : i64, tpu.core_type = #tpu.core_type<tc>, window_params = [{pipeline_mode = #tpu.pipeline_mode<synchronous>, transform_indices = @transform_0, window_bounds = array<i64: 24, 216>}, {transform_indices = @transform_1, window_bounds = array<i64: 216, 32>}, {pipeline_mode = #tpu.pipeline_mode<synchronous>, transform_indices = @transform_2, window_bounds = array<i64: 24, 1>}, {transform_indices = @transform_3, window_bounds = array<i64: 24, 32>}]} {
    %c0 = arith.constant 0 : index
    %c0_0 = arith.constant 0 : index
    %0 = vector.load %arg1[%c0, %c0_0] : memref<24x216xbf16, #tpu.memory_space<vmem>>, vector<24x216xbf16>
    %c0_1 = arith.constant 0 : index
    %c0_2 = arith.constant 0 : index
    %1 = vector.load %arg2[%c0_1, %c0_2] : memref<216x32xbf16, #tpu.memory_space<vmem>>, vector<216x32xbf16>
    %cst = arith.constant dense<0.000000e+00> : vector<24x32xf32>
    %2 = tpu.matmul %0, %1, %cst {dimension_numbers = #tpu.dot_dimension_numbers<[1], [0], [0], [1], [0, 0, 1, 1], [], []>} : vector<24x216xbf16>, vector<216x32xbf16>, vector<24x32xf32> -> vector<24x32xf32>
    %c0_3 = arith.constant 0 : index
    %c0_4 = arith.constant 0 : index
    %3 = vector.load %arg3[%c0_3, %c0_4] : memref<24x1xf32, #tpu.memory_space<vmem>>, vector<24x1xf32>
    %4 = vector.broadcast %3 : vector<24x1xf32> to vector<24x32xf32>
    %5 = arith.addf %2, %4 : vector<24x32xf32>
    %cst_5 = arith.constant 0.000000e+00 : f32
    %6 = vector.broadcast %cst_5 : f32 to vector<24x32xf32>
    %7 = arith.maximumf %5, %6 : vector<24x32xf32>
    %c0_6 = arith.constant 0 : index
    %c0_7 = arith.constant 0 : index
    %8 = vector.load %arg4[%c0_6, %c0_7] : memref<24x32xf32, #tpu.memory_space<vmem>>, vector<24x32xf32>
    tpu.vector_store %arg4[%c0_6, %c0_7], %7 {strides = array<i32>} : memref<24x32xf32, #tpu.memory_space<vmem>>, vector<24x32xf32>,
    return
  }
  func.func @transform_0(%arg0: i32) -> (i32, i32) {
    %c0_i32 = arith.constant 0 : i32
    %c0_i32_0 = arith.constant 0 : i32
    %c0_i32_1 = arith.constant 0 : i32
    return %c0_i32, %c0_i32_0 : i32, i32
  }
  func.func @transform_1(%arg0: i32) -> (i32, i32) {
    %c0_i32 = arith.constant 0 : i32
    %c0_i32_0 = arith.constant 0 : i32
    return %c0_i32, %arg0 : i32, i32
  }
  func.func @transform_2(%arg0: i32) -> (i32, i32) {
    %c0_i32 = arith.constant 0 : i32
    %c0_i32_0 = arith.constant 0 : i32
    %c0_i32_1 = arith.constant 0 : i32
    return %c0_i32, %c0_i32_0 : i32, i32
  }
  func.func @transform_3(%arg0: i32) -> (i32, i32) {
    %c0_i32 = arith.constant 0 : i32
    %c0_i32_0 = arith.constant 0 : i32
    return %c0_i32, %arg0 : i32, i32
  }
}

module attributes {stable_mosaic.version = 11 : i64} {
  func.func @_wxb_kernel(%arg0: i32, %arg1: memref<24x96xbf16, #tpu.memory_space<vmem>>, %arg2: memref<96x18xbf16, #tpu.memory_space<vmem>>, %arg3: memref<24x1xf32, #tpu.memory_space<vmem>>, %arg4: memref<24x18xf32, #tpu.memory_space<vmem>>) attributes {dimension_semantics = [#tpu.dimension_semantics<parallel>], iteration_bounds = array<i64: 1>, scalar_prefetch = 0 : i64, scratch_operands = 0 : i64, tpu.core_type = #tpu.core_type<tc>, window_params = [{pipeline_mode = #tpu.pipeline_mode<synchronous>, transform_indices = @transform_0, window_bounds = array<i64: 24, 96>}, {transform_indices = @transform_1, window_bounds = array<i64: 96, 18>}, {pipeline_mode = #tpu.pipeline_mode<synchronous>, transform_indices = @transform_2, window_bounds = array<i64: 24, 1>}, {transform_indices = @transform_3, window_bounds = array<i64: 24, 18>}]} {
    %c0 = arith.constant 0 : index
    %c0_0 = arith.constant 0 : index
    %0 = vector.load %arg1[%c0, %c0_0] : memref<24x96xbf16, #tpu.memory_space<vmem>>, vector<24x96xbf16>
    %c0_1 = arith.constant 0 : index
    %c0_2 = arith.constant 0 : index
    %1 = vector.load %arg2[%c0_1, %c0_2] : memref<96x18xbf16, #tpu.memory_space<vmem>>, vector<96x18xbf16>
    %cst = arith.constant dense<0.000000e+00> : vector<24x18xf32>
    %2 = tpu.matmul %0, %1, %cst {dimension_numbers = #tpu.dot_dimension_numbers<[1], [0], [0], [1], [0, 0, 1, 1], [], []>} : vector<24x96xbf16>, vector<96x18xbf16>, vector<24x18xf32> -> vector<24x18xf32>
    %c0_3 = arith.constant 0 : index
    %c0_4 = arith.constant 0 : index
    %3 = vector.load %arg3[%c0_3, %c0_4] : memref<24x1xf32, #tpu.memory_space<vmem>>, vector<24x1xf32>
    %4 = vector.broadcast %3 : vector<24x1xf32> to vector<24x18xf32>
    %5 = arith.addf %2, %4 : vector<24x18xf32>
    %c0_5 = arith.constant 0 : index
    %c0_6 = arith.constant 0 : index
    %6 = vector.load %arg4[%c0_5, %c0_6] : memref<24x18xf32, #tpu.memory_space<vmem>>, vector<24x18xf32>
    tpu.vector_store %arg4[%c0_5, %c0_6], %5 {strides = array<i32>} : memref<24x18xf32, #tpu.memory_space<vmem>>, vector<24x18xf32>,
    return
  }
  func.func @transform_0(%arg0: i32) -> (i32, i32) {
    %c0_i32 = arith.constant 0 : i32
    %c0_i32_0 = arith.constant 0 : i32
    %c0_i32_1 = arith.constant 0 : i32
    return %c0_i32, %c0_i32_0 : i32, i32
  }
  func.func @transform_1(%arg0: i32) -> (i32, i32) {
    %c0_i32 = arith.constant 0 : i32
    %c0_i32_0 = arith.constant 0 : i32
    return %c0_i32, %arg0 : i32, i32
  }
  func.func @transform_2(%arg0: i32) -> (i32, i32) {
    %c0_i32 = arith.constant 0 : i32
    %c0_i32_0 = arith.constant 0 : i32
    %c0_i32_1 = arith.constant 0 : i32
    return %c0_i32, %c0_i32_0 : i32, i32
  }
  func.func @transform_3(%arg0: i32) -> (i32, i32) {
    %c0_i32 = arith.constant 0 : i32
    %c0_i32_0 = arith.constant 0 : i32
    return %c0_i32, %arg0 : i32, i32
  }
}

module attributes {stable_mosaic.version = 11 : i64} {
  func.func @_wxb_kernel(%arg0: i32, %arg1: memref<12x216xbf16, #tpu.memory_space<vmem>>, %arg2: memref<216x50xbf16, #tpu.memory_space<vmem>>, %arg3: memref<12x1xf32, #tpu.memory_space<vmem>>, %arg4: memref<12x50xf32, #tpu.memory_space<vmem>>) attributes {dimension_semantics = [#tpu.dimension_semantics<parallel>], iteration_bounds = array<i64: 1>, scalar_prefetch = 0 : i64, scratch_operands = 0 : i64, tpu.core_type = #tpu.core_type<tc>, window_params = [{pipeline_mode = #tpu.pipeline_mode<synchronous>, transform_indices = @transform_0, window_bounds = array<i64: 12, 216>}, {transform_indices = @transform_1, window_bounds = array<i64: 216, 50>}, {pipeline_mode = #tpu.pipeline_mode<synchronous>, transform_indices = @transform_2, window_bounds = array<i64: 12, 1>}, {transform_indices = @transform_3, window_bounds = array<i64: 12, 50>}]} {
    %c0 = arith.constant 0 : index
    %c0_0 = arith.constant 0 : index
    %0 = vector.load %arg1[%c0, %c0_0] : memref<12x216xbf16, #tpu.memory_space<vmem>>, vector<12x216xbf16>
    %c0_1 = arith.constant 0 : index
    %c0_2 = arith.constant 0 : index
    %1 = vector.load %arg2[%c0_1, %c0_2] : memref<216x50xbf16, #tpu.memory_space<vmem>>, vector<216x50xbf16>
    %cst = arith.constant dense<0.000000e+00> : vector<12x50xf32>
    %2 = tpu.matmul %0, %1, %cst {dimension_numbers = #tpu.dot_dimension_numbers<[1], [0], [0], [1], [0, 0, 1, 1], [], []>} : vector<12x216xbf16>, vector<216x50xbf16>, vector<12x50xf32> -> vector<12x50xf32>
    %c0_3 = arith.constant 0 : index
    %c0_4 = arith.constant 0 : index
    %3 = vector.load %arg3[%c0_3, %c0_4] : memref<12x1xf32, #tpu.memory_space<vmem>>, vector<12x1xf32>
    %4 = vector.broadcast %3 : vector<12x1xf32> to vector<12x50xf32>
    %5 = arith.addf %2, %4 : vector<12x50xf32>
    %cst_5 = arith.constant 0.000000e+00 : f32
    %6 = vector.broadcast %cst_5 : f32 to vector<12x50xf32>
    %7 = arith.maximumf %5, %6 : vector<12x50xf32>
    %c0_6 = arith.constant 0 : index
    %c0_7 = arith.constant 0 : index
    %8 = vector.load %arg4[%c0_6, %c0_7] : memref<12x50xf32, #tpu.memory_space<vmem>>, vector<12x50xf32>
    tpu.vector_store %arg4[%c0_6, %c0_7], %7 {strides = array<i32>} : memref<12x50xf32, #tpu.memory_space<vmem>>, vector<12x50xf32>,
    return
  }
  func.func @transform_0(%arg0: i32) -> (i32, i32) {
    %c0_i32 = arith.constant 0 : i32
    %c0_i32_0 = arith.constant 0 : i32
    %c0_i32_1 = arith.constant 0 : i32
    return %c0_i32, %c0_i32_0 : i32, i32
  }
  func.func @transform_1(%arg0: i32) -> (i32, i32) {
    %c0_i32 = arith.constant 0 : i32
    %c0_i32_0 = arith.constant 0 : i32
    return %c0_i32, %arg0 : i32, i32
  }
  func.func @transform_2(%arg0: i32) -> (i32, i32) {
    %c0_i32 = arith.constant 0 : i32
    %c0_i32_0 = arith.constant 0 : i32
    %c0_i32_1 = arith.constant 0 : i32
    return %c0_i32, %c0_i32_0 : i32, i32
  }
  func.func @transform_3(%arg0: i32) -> (i32, i32) {
    %c0_i32 = arith.constant 0 : i32
    %c0_i32_0 = arith.constant 0 : i32
    return %c0_i32, %arg0 : i32, i32
  }
}

module attributes {stable_mosaic.version = 11 : i64} {
  func.func @_wxb_kernel(%arg0: i32, %arg1: memref<6x108xbf16, #tpu.memory_space<vmem>>, %arg2: memref<108x162xbf16, #tpu.memory_space<vmem>>, %arg3: memref<6x1xf32, #tpu.memory_space<vmem>>, %arg4: memref<6x162xf32, #tpu.memory_space<vmem>>) attributes {dimension_semantics = [#tpu.dimension_semantics<parallel>], iteration_bounds = array<i64: 1>, scalar_prefetch = 0 : i64, scratch_operands = 0 : i64, tpu.core_type = #tpu.core_type<tc>, window_params = [{pipeline_mode = #tpu.pipeline_mode<synchronous>, transform_indices = @transform_0, window_bounds = array<i64: 6, 108>}, {transform_indices = @transform_1, window_bounds = array<i64: 108, 162>}, {pipeline_mode = #tpu.pipeline_mode<synchronous>, transform_indices = @transform_2, window_bounds = array<i64: 6, 1>}, {transform_indices = @transform_3, window_bounds = array<i64: 6, 162>}]} {
    %c0 = arith.constant 0 : index
    %c0_0 = arith.constant 0 : index
    %0 = vector.load %arg1[%c0, %c0_0] : memref<6x108xbf16, #tpu.memory_space<vmem>>, vector<6x108xbf16>
    %c0_1 = arith.constant 0 : index
    %c0_2 = arith.constant 0 : index
    %1 = vector.load %arg2[%c0_1, %c0_2] : memref<108x162xbf16, #tpu.memory_space<vmem>>, vector<108x162xbf16>
    %cst = arith.constant dense<0.000000e+00> : vector<6x162xf32>
    %2 = tpu.matmul %0, %1, %cst {dimension_numbers = #tpu.dot_dimension_numbers<[1], [0], [0], [1], [0, 0, 1, 1], [], []>} : vector<6x108xbf16>, vector<108x162xbf16>, vector<6x162xf32> -> vector<6x162xf32>
    %c0_3 = arith.constant 0 : index
    %c0_4 = arith.constant 0 : index
    %3 = vector.load %arg3[%c0_3, %c0_4] : memref<6x1xf32, #tpu.memory_space<vmem>>, vector<6x1xf32>
    %4 = vector.broadcast %3 : vector<6x1xf32> to vector<6x162xf32>
    %5 = arith.addf %2, %4 : vector<6x162xf32>
    %cst_5 = arith.constant 0.000000e+00 : f32
    %6 = vector.broadcast %cst_5 : f32 to vector<6x162xf32>
    %7 = arith.maximumf %5, %6 : vector<6x162xf32>
    %c0_6 = arith.constant 0 : index
    %c0_7 = arith.constant 0 : index
    %8 = vector.load %arg4[%c0_6, %c0_7] : memref<6x162xf32, #tpu.memory_space<vmem>>, vector<6x162xf32>
    tpu.vector_store %arg4[%c0_6, %c0_7], %7 {strides = array<i32>} : memref<6x162xf32, #tpu.memory_space<vmem>>, vector<6x162xf32>,
    return
  }
  func.func @transform_0(%arg0: i32) -> (i32, i32) {
    %c0_i32 = arith.constant 0 : i32
    %c0_i32_0 = arith.constant 0 : i32
    %c0_i32_1 = arith.constant 0 : i32
    return %c0_i32, %c0_i32_0 : i32, i32
  }
  func.func @transform_1(%arg0: i32) -> (i32, i32) {
    %c0_i32 = arith.constant 0 : i32
    %c0_i32_0 = arith.constant 0 : i32
    return %c0_i32, %arg0 : i32, i32
  }
  func.func @transform_2(%arg0: i32) -> (i32, i32) {
    %c0_i32 = arith.constant 0 : i32
    %c0_i32_0 = arith.constant 0 : i32
    %c0_i32_1 = arith.constant 0 : i32
    return %c0_i32, %c0_i32_0 : i32, i32
  }
  func.func @transform_3(%arg0: i32) -> (i32, i32) {
    %c0_i32 = arith.constant 0 : i32
    %c0_i32_0 = arith.constant 0 : i32
    return %c0_i32, %arg0 : i32, i32
  }
}

module attributes {stable_mosaic.version = 11 : i64} {
  func.func @_wxb_kernel(%arg0: i32, %arg1: memref<3x54xbf16, #tpu.memory_space<vmem>>, %arg2: memref<54x578xbf16, #tpu.memory_space<vmem>>, %arg3: memref<3x1xf32, #tpu.memory_space<vmem>>, %arg4: memref<3x578xf32, #tpu.memory_space<vmem>>) attributes {dimension_semantics = [#tpu.dimension_semantics<parallel>], iteration_bounds = array<i64: 1>, scalar_prefetch = 0 : i64, scratch_operands = 0 : i64, tpu.core_type = #tpu.core_type<tc>, window_params = [{pipeline_mode = #tpu.pipeline_mode<synchronous>, transform_indices = @transform_0, window_bounds = array<i64: 3, 54>}, {transform_indices = @transform_1, window_bounds = array<i64: 54, 578>}, {pipeline_mode = #tpu.pipeline_mode<synchronous>, transform_indices = @transform_2, window_bounds = array<i64: 3, 1>}, {transform_indices = @transform_3, window_bounds = array<i64: 3, 578>}]} {
    %c0 = arith.constant 0 : index
    %c0_0 = arith.constant 0 : index
    %0 = vector.load %arg1[%c0, %c0_0] : memref<3x54xbf16, #tpu.memory_space<vmem>>, vector<3x54xbf16>
    %c0_1 = arith.constant 0 : index
    %c0_2 = arith.constant 0 : index
    %1 = vector.load %arg2[%c0_1, %c0_2] : memref<54x578xbf16, #tpu.memory_space<vmem>>, vector<54x578xbf16>
    %cst = arith.constant dense<0.000000e+00> : vector<3x578xf32>
    %2 = tpu.matmul %0, %1, %cst {dimension_numbers = #tpu.dot_dimension_numbers<[1], [0], [0], [1], [0, 0, 1, 1], [], []>} : vector<3x54xbf16>, vector<54x578xbf16>, vector<3x578xf32> -> vector<3x578xf32>
    %c0_3 = arith.constant 0 : index
    %c0_4 = arith.constant 0 : index
    %3 = vector.load %arg3[%c0_3, %c0_4] : memref<3x1xf32, #tpu.memory_space<vmem>>, vector<3x1xf32>
    %4 = vector.broadcast %3 : vector<3x1xf32> to vector<3x578xf32>
    %5 = arith.addf %2, %4 : vector<3x578xf32>
    %cst_5 = arith.constant 0.000000e+00 : f32
    %6 = vector.broadcast %cst_5 : f32 to vector<3x578xf32>
    %7 = arith.maximumf %5, %6 : vector<3x578xf32>
    %c0_6 = arith.constant 0 : index
    %c0_7 = arith.constant 0 : index
    %8 = vector.load %arg4[%c0_6, %c0_7] : memref<3x578xf32, #tpu.memory_space<vmem>>, vector<3x578xf32>
    tpu.vector_store %arg4[%c0_6, %c0_7], %7 {strides = array<i32>} : memref<3x578xf32, #tpu.memory_space<vmem>>, vector<3x578xf32>,
    return
  }
  func.func @transform_0(%arg0: i32) -> (i32, i32) {
    %c0_i32 = arith.constant 0 : i32
    %c0_i32_0 = arith.constant 0 : i32
    %c0_i32_1 = arith.constant 0 : i32
    return %c0_i32, %c0_i32_0 : i32, i32
  }
  func.func @transform_1(%arg0: i32) -> (i32, i32) {
    %c0_i32 = arith.constant 0 : i32
    %c0_i32_0 = arith.constant 0 : i32
    return %c0_i32, %arg0 : i32, i32
  }
  func.func @transform_2(%arg0: i32) -> (i32, i32) {
    %c0_i32 = arith.constant 0 : i32
    %c0_i32_0 = arith.constant 0 : i32
    %c0_i32_1 = arith.constant 0 : i32
    return %c0_i32, %c0_i32_0 : i32, i32
  }
  func.func @transform_3(%arg0: i32) -> (i32, i32) {
    %c0_i32 = arith.constant 0 : i32
    %c0_i32_0 = arith.constant 0 : i32
    return %c0_i32, %arg0 : i32, i32
  }
}

</mosaic_0001>

<bundles_post_ra>
// kernel: riabnet_forward.15
= control target key start
LH: loop header
LB: loop body
LE: loop exit
PB: predicated region body
PF: predicated region fallthrough
CT: control target
= control target key end

     0   :  { %vm41_vm0 = vcmask 1044480   ;;  %vm42_vm1 = vcmask 1045504   ;;  %v115_v0 = vmov 0.0   ;;  %v116_v2 = vmov 65535   ;;  %s154_s1 = inlined_call_operand.vmem [shape: bf16[27,128], index: 1, kind: input, shape index: {}]   ;;  %s155_s2 = inlined_call_operand.vmem [shape: f32[6,1], index: 2, kind: input, shape index: {}]   ;;  %s156_s0 = inlined_call_operand.vmem [shape: bf16[6,27], index: 0, kind: input, shape index: {}]   ;;  %s157_s3 = inlined_call_operand.vmem [shape: f32[6,128], index: 3, kind: output, shape index: {}]  }
   0x1   :  { %100 = vmatprep.subr.bf16.mxu0 %v115_v0  ;;  %v113_v1 = vld [vmem:[%s154_s1] sm:$0xff]   ;;  %v43_v3 = vsel %vm41_vm0, 4294967295, %v116_v2  ;;  %v114_v4 = vld [vmem:[%s154_s1 + $0x8] sm:$0x3f]   ;;  %vm117_vm2 = vmmov 0   ;;  %v118_v8 = vmov 0  }
   0x2   :  { %101 = vmatpush3.bf16.msra.mxu0 %v113_v1  ;;  %v44_v5 = vsel %vm42_vm1, %v43_v3, 0  ;;  %104 = vmatprep.mubr.msk.bf16.mxu0 %vm117_vm2, %v115_v0  ;;  %v20_v7 = vld [vmem:[%s155_s2] sm:$0x3f]  ;;  %vm37_vm3 = vcmask 220160  }
   0x3   :  { %102 = vmatprep.subr.bf16.mxu0 %v115_v0  ;;  %v46_v6 = vand.u32 %v114_v4, %v44_v5  ;;  %112 = vset.pattern.permute.xlu0 %v118_v8  ;;  %v15_v9 = vld [vmem:[%s156_s0] sm:$0x7] }
   0x4   :  { %23 = vperm.xlu0 %112, %v20_v7  }
   0x6   :  { %103 = vmatpush3.bf16.msra.mxu0 %v46_v6 }
   0x9   :  { %105 = vmatmul.mubr.msk.bf16.vlgmr.msra.gmra.mrb[0].mxu0 %vm37_vm3, %v15_v9 }
  0x83   :  { %v24_v10 = vpop.permute.xlu0 %23 }
  0xdc   :  { %v82_v11 = vpop.f32.mrb[0].mxu0 }
  0xdd   :  { %v83_v12 = vadd.f32 %v82_v11, %v24_v10  ;;  %v106_v13 = vpop.f32.mrb[1].mxu0 }
  0xde   :  { %v85_v14 = vpop.f32.mrb[2].mxu0 }
  0xdf   :  { %v88_v15 = vmax.f32 %v83_v12, 0.0  ;;  %v107_v16 = vpop.f32.mrb[3].mxu0 }
  0xe1   :  { %89 = vst [vmem:[%s157_s3] sm:$0x3f] %v88_v15 }

// kernel: riabnet_forward.16
= control target key start
LH: loop header
LB: loop body
LE: loop exit
PB: predicated region body
PF: predicated region fallthrough
CT: control target
= control target key end

     0   :  { %v153_v0 = vmov 0.0   ;;  %vm154_vm0 = vmmov 0   ;;  %v155_v2 = vmov 0   ;;  %vm66_vm1 = vcmask 1042432   ;;  %s203_s1 = inlined_call_operand.vmem [shape: bf16[54,32], index: 1, kind: input, shape index: {}]   ;;  %s204_s2 = inlined_call_operand.vmem [shape: f32[12,1], index: 2, kind: input, shape index: {}]   ;;  %s205_s0 = inlined_call_operand.vmem [shape: bf16[12,54], index: 0, kind: input, shape index: {}]   ;;  %s206_s3 = inlined_call_operand.vmem [shape: f32[12,32], index: 3, kind: output, shape index: {}]  }
   0x1   :  { %132 = vmatprep.subr.bf16.mxu0 %v153_v0  ;;  %v148_v1 = vld [vmem:[%s203_s1] sm:$0xff]   ;;  %140 = vmatprep.mubr.msk.bf16.mxu0 %vm154_vm0, %v153_v0  ;;  %v149_v3 = vld [vmem:[%s203_s1 + $0x8] sm:$0xff]   ;;  %v150_v6 = vld [vmem:[%s203_s1 + $0x10] sm:$0xff]   ;;  %vm62_vm2 = vcmask 441344   ;;  %vm113_vm3 = vcmask 261120   ;;  %vm115_vm4 = vcmask 257024  }
   0x2   :  { %147 = vset.pattern.permute.xlu0 %v155_v2  ;;  %133 = vmatpush3.bf16.msra.mxu0 %v148_v1  ;;  %v24_v4 = vld [vmem:[%s204_s2] sm:$0xff]  ;;  %v25_v5 = vld [vmem:[%s204_s2 + $0x8] sm:$0xf]  ;;  %v151_v7 = vld [vmem:[%s203_s1 + $0x18] ss:$0 sps:$4 sm:$0x77]  }
   0x3   :  { %134 = vmatprep.subr.bf16.mxu0 %v153_v0  ;;  %28 = vperm.xlu0 %147, %v24_v4   ;;  %v68_v8 = vsel %vm66_vm1, %v151_v7, 0  ;;  %v152_v9 = vld [vmem:[%s205_s0] sm:$0x3f]  }
   0x6   :  { %135 = vmatpush3.bf16.msra.mxu0 %v149_v3 }
   0x7   :  { %136 = vmatprep.subr.bf16.mxu0 %v153_v0  ;;  %33 = vperm.xlu0 %147, %v25_v5  }
   0xa   :  { %137 = vmatpush3.bf16.msra.mxu0 %v150_v6 }
   0xb   :  { %138 = vmatprep.subr.bf16.mxu0 %v153_v0 }
   0xe   :  { %139 = vmatpush3.bf16.msra.mxu0 %v68_v8 }
  0x11   :  { %141 = vmatmul.mubr.msk.bf16.vlgmr.msra.gmra.mrb[0].mxu0 %vm62_vm2, %v152_v9 }
  0x82   :  { %v29_v10 = vpop.permute.xlu0 %28 }
  0x86   :  { %v34_v14 = vpop.permute.xlu0 %33 }
  0xe4   :  { %v104_v11 = vpop.f32.mrb[0].mxu0 }
  0xe5   :  { %v105_v12 = vadd.f32 %v104_v11, %v29_v10  ;;  %v142_v13 = vpop.f32.mrb[1].mxu0 }
  0xe6   :  { %v107_v15 = vpop.f32.mrb[2].mxu0 }
  0xe7   :  { %v111_v16 = vmax.f32 %v105_v12, 0.0  ;;  %v108_v17 = vadd.f32 %v107_v15, %v34_v14  ;;  %v143_v18 = vpop.f32.mrb[3].mxu0 }
  0xe9   :  { %114 = vst.msk [vmem:[%s206_s3] sm:$0xff] %vm113_vm3, %v111_v16  ;;  %v112_v19 = vmax.f32 %v108_v17, 0.0 }
  0xeb   :  { %116 = vst.msk [vmem:[%s206_s3 + $0x8] sm:$0xf] %vm115_vm4, %v112_v19 }

// kernel: riabnet_forward.17
= control target key start
LH: loop header
LB: loop body
LE: loop exit
PB: predicated region body
PF: predicated region fallthrough
CT: control target
= control target key end

     0   :  { %v220_v1 = vmov 0   ;;  %vm99_vm0 = vcmask 883712   ;;  %vm106_vm1 = vcmask 1045504   ;;  %vm161_vm2 = vcmask 64512   ;;  %s288_s1 = inlined_call_operand.vmem [shape: bf16[108,8], index: 1, kind: input, shape index: {}]   ;;  %s289_s0 = inlined_call_operand.vmem [shape: bf16[24,108], index: 0, kind: input, shape index: {}]   ;;  %s290_s2 = inlined_call_operand.vmem [shape: f32[24,1], index: 2, kind: input, shape index: {}]   ;;  %s291_s3 = inlined_call_operand.vmem [shape: f32[24,8], index: 3, kind: output, shape index: {}]  }
   0x1   :  { %v211_v0 = vld [vmem:[%s288_s1] sm:$0xff]   ;;  %209 = vset.pattern.permute.xlu0 %v220_v1  ;;  %210 = vset.pattern.permute.xlu1 %v220_v1  ;;  %v212_v2 = vld [vmem:[%s288_s1 + $0x8] sm:$0xff]   ;;  %v213_v3 = vld [vmem:[%s288_s1 + $0x10] sm:$0xff]  }
   0x2   :  { %189 = vmatprep.subr.bf16.mxu0 %v211_v0  ;;  %v214_v4 = vld [vmem:[%s288_s1 + $0x18] sm:$0xff]   ;;  %v218_v5 = vld [vmem:[%s289_s0] sm:$0xff]   ;;  %v34_v7 = vld [vmem:[%s290_s2 + $0x10] sm:$0xff] }
   0x3   :  { %190 = vmatpush3.bf16.msra.mxu0 %v211_v0  ;;  %v32_v6 = vld [vmem:[%s290_s2] sm:$0xff]  ;;  %203 = vmatprep.mubr.msk.bf16.mxu0 %vm99_vm0, %v218_v5  ;;  %v33_v8 = vld [vmem:[%s290_s2 + $0x8] sm:$0xff]  ;;  %v217_v11 = vld [vmem:[%s288_s1 + $0x30] sm:$0x3f]  }
   0x4   :  { %191 = vmatprep.subr.bf16.mxu0 %v212_v2  ;;  %37 = vperm.xlu0 %209, %v32_v6   ;;  %v215_v9 = vld [vmem:[%s288_s1 + $0x20] sm:$0xff]   ;;  %v216_v10 = vld [vmem:[%s288_s1 + $0x28] sm:$0xff]   ;;  %v108_v12 = vsel %vm106_vm1, %v217_v11, 0 }
   0x5   :  { %47 = vperm.xlu1 %210, %v34_v7   ;;  %v219_v13 = vld [vmem:[%s289_s0 + $0x8] ss:$0 sps:$4 sm:$0xff]  }
   0x7   :  { %192 = vmatpush3.bf16.msra.mxu0 %v212_v2 }
   0x8   :  { %193 = vmatprep.subr.bf16.mxu0 %v213_v3  ;;  %42 = vperm.xlu0 %209, %v33_v8  }
   0xb   :  { %194 = vmatpush3.bf16.msra.mxu0 %v213_v3 }
   0xc   :  { %195 = vmatprep.subr.bf16.mxu0 %v214_v4 }
   0xf   :  { %196 = vmatpush3.bf16.msra.mxu0 %v214_v4 }
  0x10   :  { %197 = vmatprep.subr.bf16.mxu0 %v215_v9 }
  0x13   :  { %198 = vmatpush3.bf16.msra.mxu0 %v215_v9 }
  0x14   :  { %199 = vmatprep.subr.bf16.mxu0 %v216_v10 }
  0x17   :  { %200 = vmatpush3.bf16.msra.mxu0 %v216_v10 }
  0x18   :  { %207 = vmatprep.subr.msk.bf16.mxu0 %vm106_vm1, %v217_v11 }
  0x1b   :  { %202 = vmatpush3.bf16.msra.mxu0 %v108_v12 }
  0x1e   :  { %204 = vmatmul.mubr.msk.bf16.vlgmr.msra.gmra.mrb[0].mxu0 %vm99_vm0, %v219_v13 }
  0x83   :  { %v38_v14 = vpop.permute.xlu0 %37 }
  0x84   :  { %v48_v15 = vpop.permute.xlu1 %47 }
  0x87   :  { %v43_v21 = vpop.permute.xlu0 %42 }
  0xf1   :  { %v205_v16 = vpop.f32.mrb[0].mxu0 }
  0xf2   :  { %v153_v17 = vadd.f32 %v205_v16, %v48_v15  ;;  %v144_v18 = vpop.f32.mrb[1].mxu0 }
  0xf3   :  { %v145_v19 = vadd.f32 %v144_v18, %v38_v14  ;;  %v206_v20 = vpop.f32.mrb[2].mxu0 }
  0xf4   :  { %v160_v22 = vmax.f32 %v153_v17, 0.0  ;;  %v147_v23 = vpop.f32.mrb[3].mxu0 }
  0xf5   :  { %v158_v24 = vmax.f32 %v145_v19, 0.0  ;;  %v148_v25 = vadd.f32 %v147_v23, %v43_v21 }
  0xf6   :  { %164 = vst.msk [vmem:[%s291_s3 + $0x10] sm:$0xff] %vm161_vm2, %v160_v22 }
  0xf7   :  { %162 = vst.msk [vmem:[%s291_s3] sm:$0xff] %vm161_vm2, %v158_v24  ;;  %v159_v26 = vmax.f32 %v148_v25, 0.0 }
  0xf9   :  { %163 = vst.msk [vmem:[%s291_s3 + $0x8] sm:$0xff] %vm161_vm2, %v159_v26 }

// kernel: riabnet_forward.18
= control target key start
LH: loop header
LB: loop body
LE: loop exit
PB: predicated region body
PF: predicated region fallthrough
CT: control target
= control target key end

     0   :  { %v734_v1 = vmov 0   ;;  %vm384_vm0 = vcmask 719872   ;;  %vm391_vm1 = vcmask 1043456   ;;  %vm542_vm2 = vcmask 64512   ;;  %s913_s1 = inlined_call_operand.vmem [shape: bf16[600,8], index: 1, kind: input, shape index: {}]   ;;  %s914_s0 = inlined_call_operand.vmem [shape: bf16[24,600], index: 0, kind: input, shape index: {}]   ;;  %s915_s2 = inlined_call_operand.vmem [shape: f32[24,1], index: 2, kind: input, shape index: {}]   ;;  %s916_s3 = inlined_call_operand.vmem [shape: f32[24,8], index: 3, kind: output, shape index: {}]  }
   0x1   :  { %v684_v0 = vld [vmem:[%s913_s1 + $0x40] sm:$0xff]   ;;  %682 = vset.pattern.permute.xlu0 %v734_v1  ;;  %683 = vset.pattern.permute.xlu1 %v734_v1  ;;  %v688_v5 = vld [vmem:[%s913_s1 + $0x48] sm:$0xff]   ;;  %v692_v9 = vld [vmem:[%s913_s1 + $0x50] sm:$0xff]  }
   0x2   :  { %v685_v2 = vld [vmem:[%s913_s1] sm:$0xff]   ;;  %600 = vmatprep.subr.bf16.mxu0 %v684_v0  ;;  %v689_v6 = vld [vmem:[%s913_s1 + $0x8] sm:$0xff]   ;;  %v693_v10 = vld [vmem:[%s913_s1 + $0x10] sm:$0xff]  }
   0x3   :  { %v686_v3 = vld [vmem:[%s913_s1 + $0xc0] sm:$0xff]   ;;  %601 = vmatpush3.bf16.msra.mxu0 %v685_v2  ;;  %v690_v7 = vld [vmem:[%s913_s1 + $0xc8] sm:$0xff]   ;;  %v694_v11 = vld [vmem:[%s913_s1 + $0xd0] sm:$0xff]  }
   0x4   :  { %v687_v4 = vld [vmem:[%s913_s1 + $0x80] sm:$0xff]   ;;  %628 = vmatprep.subr.bf16.mxu1 %v686_v3  ;;  %602 = vmatprep.subr.bf16.mxu0 %v688_v5  ;;  %v691_v8 = vld [vmem:[%s913_s1 + $0x88] sm:$0xff]   ;;  %v695_v12 = vld [vmem:[%s913_s1 + $0x90] sm:$0xff]  }
   0x5   :  { %629 = vmatpush3.bf16.msra.mxu1 %v687_v4  ;;  %v696_v13 = vld [vmem:[%s913_s1 + $0x58] sm:$0xff]   ;;  %v700_v17 = vld [vmem:[%s913_s1 + $0x60] sm:$0xff]   ;;  %v704_v21 = vld [vmem:[%s913_s1 + $0x68] sm:$0xff]  }
   0x6   :  { %630 = vmatprep.subr.bf16.mxu1 %v690_v7  ;;  %v697_v14 = vld [vmem:[%s913_s1 + $0x18] sm:$0xff]   ;;  %v701_v18 = vld [vmem:[%s913_s1 + $0x20] sm:$0xff]   ;;  %v705_v22 = vld [vmem:[%s913_s1 + $0x28] sm:$0xff]  }
   0x7   :  { %603 = vmatpush3.bf16.msra.mxu0 %v689_v6  ;;  %v698_v15 = vld [vmem:[%s913_s1 + $0xd8] sm:$0xff]   ;;  %v702_v19 = vld [vmem:[%s913_s1 + $0xe0] sm:$0xff]   ;;  %v706_v23 = vld [vmem:[%s913_s1 + $0xe8] sm:$0xff]  }
   0x8   :  { %604 = vmatprep.subr.bf16.mxu0 %v692_v9  ;;  %v699_v16 = vld [vmem:[%s913_s1 + $0x98] sm:$0xff]   ;;  %v703_v20 = vld [vmem:[%s913_s1 + $0xa0] sm:$0xff]   ;;  %v707_v24 = vld [vmem:[%s913_s1 + $0xa8] sm:$0xff]  }
   0x9   :  { %631 = vmatpush3.bf16.msra.mxu1 %v691_v8  ;;  %v708_v25 = vld [vmem:[%s913_s1 + $0x70] sm:$0xff]   ;;  %v712_v29 = vld [vmem:[%s913_s1 + $0x78] sm:$0xff]   ;;  %v719_v35 = vld [vmem:[%s913_s1 + $0x100] sm:$0xff]  }
   0xa   :  { %632 = vmatprep.subr.bf16.mxu1 %v694_v11  ;;  %v709_v26 = vld [vmem:[%s913_s1 + $0x30] sm:$0xff]   ;;  %v713_v30 = vld [vmem:[%s913_s1 + $0x38] sm:$0xff]   ;;  %v722_v37 = vld [vmem:[%s914_s0 + $0xc] ss:$20 sps:$4 sm:$0xff]  }
   0xb   :  { %605 = vmatpush3.bf16.msra.mxu0 %v693_v10  ;;  %v710_v27 = vld [vmem:[%s913_s1 + $0xf0] sm:$0xff]   ;;  %v714_v31 = vld [vmem:[%s913_s1 + $0xf8] sm:$0xff]   ;;  %v723_v38 = vld [vmem:[%s913_s1 + $0x108] sm:$0xff]   ;;  %475 = vmatprep.mubr.bf16.mxu1 %v722_v37 }
   0xc   :  { %606 = vmatprep.subr.bf16.mxu0 %v696_v13  ;;  %v711_v28 = vld [vmem:[%s913_s1 + $0xb0] sm:$0xff]   ;;  %v717_v33 = vld [vmem:[%s914_s0 + $0x4] ss:$20 sps:$4 sm:$0xff]   ;;  %v720_v36 = vld [vmem:[%s914_s0 + $0x8] ss:$20 sps:$4 sm:$0xff]  }
   0xd   :  { %633 = vmatpush3.bf16.msra.mxu1 %v695_v12  ;;  %v715_v32 = vld [vmem:[%s914_s0] ss:$20 sps:$4 sm:$0xff]   ;;  %v718_v34 = vld [vmem:[%s913_s1 + $0xb8] sm:$0xff]   ;;  %427 = vmatprep.mubr.bf16.mxu0 %v717_v33  ;;  %v21_v39 = vld [vmem:[%s914_s0 + $0x28] sm:$0xff] }
   0xe   :  { %634 = vmatprep.subr.bf16.mxu1 %v698_v15  ;;  %v724_v40 = vld [vmem:[%s913_s1 + $0x110] sm:$0xff]   ;;  %v556_v41 = vcombine.high %v21_v39, %v21_v39  ;;  %v555_v42 = vcombine.low %v21_v39, %v21_v39  ;;  %v726_v46 = vld [vmem:[%s913_s1 + $0x118] sm:$0xff]   ;;  %v99_v48 = vld [vmem:[%s915_s2] sm:$0xff] }
   0xf   :  { %607 = vmatpush3.bf16.msra.mxu0 %v697_v14  ;;  %v22_v43 = vld [vmem:[%s914_s0 + $0x30] sm:$0xff]  ;;  %104 = vperm.xlu0 %682, %v99_v48   ;;  %v100_v50 = vld [vmem:[%s915_s2 + $0x8] sm:$0xff]  ;;  %v729_v51 = vld [vmem:[%s913_s1 + $0x120] sm:$0xff]  }
  0x10   :  { %608 = vmatprep.subr.bf16.mxu0 %v700_v17  ;;  %v558_v44 = vcombine.high %v22_v43, %v22_v43  ;;  %v732_v45 = vld [vmem:[%s914_s0 + $0x10] ss:$20 sps:$4 sm:$0xff]   ;;  %v557_v47 = vcombine.low %v22_v43, %v22_v43  ;;  %v731_v52 = vld [vmem:[%s913_s1 + $0x128] ss:$0 sps:$4 sm:$0xff]   ;;  %v733_v54 = vld [vmem:[%s914_s0 + $0x38] ss:$0 sps:$4 sm:$0xff]  }
  0x11   :  { %635 = vmatpush3.bf16.msra.mxu1 %v699_v16  ;;  %v101_v49 = vld [vmem:[%s915_s2 + $0x10] sm:$0xff]  ;;  %v393_v53 = vsel %vm391_vm1, %v731_v52, 0 }
  0x12   :  { %636 = vmatprep.subr.bf16.mxu1 %v702_v19  ;;  %114 = vperm.xlu1 %683, %v101_v49  }
  0x13   :  { %609 = vmatpush3.bf16.msra.mxu0 %v701_v18  ;;  %109 = vperm.xlu0 %682, %v100_v50  }
  0x14   :  { %610 = vmatprep.subr.bf16.mxu0 %v704_v21 }
  0x15   :  { %637 = vmatpush3.bf16.msra.mxu1 %v703_v20 }
  0x16   :  { %638 = vmatprep.subr.bf16.mxu1 %v706_v23 }
  0x17   :  { %611 = vmatpush3.bf16.msra.mxu0 %v705_v22 }
  0x18   :  { %612 = vmatprep.subr.bf16.mxu0 %v708_v25 }
  0x19   :  { %639 = vmatpush3.bf16.msra.mxu1 %v707_v24 }
  0x1a   :  { %640 = vmatprep.subr.bf16.mxu1 %v710_v27 }
  0x1b   :  { %613 = vmatpush3.bf16.msra.mxu0 %v709_v26 }
  0x1c   :  { %614 = vmatprep.subr.bf16.mxu0 %v712_v29 }
  0x1d   :  { %641 = vmatpush3.bf16.msra.mxu1 %v711_v28 }
  0x1e   :  { %642 = vmatprep.subr.bf16.mxu1 %v714_v31 }
  0x1f   :  { %615 = vmatpush3.bf16.msra.mxu0 %v713_v30 }
  0x20   :  { %664 = vmatprep.subr.bf16.mxu0 %v719_v35 }
  0x21   :  { %643 = vmatpush3.bf16.msra.mxu1 %v718_v34 }
  0x22   :  { %428 = vmatmul.mubr.bf16.vlgmr.msra.gmra.mrb[0].mxu0 %v715_v32 }
  0x23   :  { %665 = vmatpush3.bf16.msra.mxu0 %v719_v35  ;;  %435 = vmatprep.mubr.bf16.mxu0 %v556_v41 }
  0x24   :  { %476 = vmatmul.mubr.bf16.vlgmr.msra.gmra.mrb[0].mxu1 %v720_v36  ;;  %666 = vmatprep.subr.bf16.mxu0 %v723_v38 }
  0x25   :  { %483 = vmatprep.mubr.bf16.mxu1 %v558_v44 }
  0x27   :  { %667 = vmatpush3.bf16.msra.mxu0 %v723_v38 }
  0x28   :  { %668 = vmatprep.subr.bf16.mxu0 %v724_v40 }
  0x2a   :  { %436 = vmatmul.mubr.bf16.gmra.mrb[4].mxu0 %v555_v42 }
  0x2b   :  { %676 = vmatprep.mubr.msk.bf16.mxu0 %vm384_vm0, %v732_v45  ;;  %669 = vmatpush3.bf16.msra.mxu0 %v724_v40 }
  0x2c   :  { %670 = vmatprep.subr.bf16.mxu0 %v726_v46  ;;  %484 = vmatmul.mubr.bf16.gmra.mrb[4].mxu1 %v557_v47 }
  0x2f   :  { %671 = vmatpush3.bf16.msra.mxu0 %v726_v46 }
  0x30   :  { %672 = vmatprep.subr.bf16.mxu0 %v729_v51 }
  0x33   :  { %673 = vmatpush3.bf16.msra.mxu0 %v729_v51 }
  0x34   :  { %680 = vmatprep.subr.msk.bf16.mxu0 %vm391_vm1, %v731_v52 }
  0x37   :  { %675 = vmatpush3.bf16.msra.mxu0 %v393_v53 }
  0x3a   :  { %677 = vmatmul.mubr.msk.bf16.vlgmr.msra.gmra.mrb[8].mxu0 %vm384_vm0, %v733_v54 }
  0x8e   :  { %v105_v55 = vpop.permute.xlu0 %104 }
  0x91   :  { %v115_v10 = vpop.permute.xlu1 %114 }
  0x92   :  { %v110_v60 = vpop.permute.xlu0 %109 }
  0xf5   :  { %v616_v56 = vpop.f32.mrb[0].mxu0 }
  0xf6   :  { %v617_v57 = vpop.f32.mrb[1].mxu0 }
  0xf7   :  { %v618_v58 = vadd.f32 %v617_v57, %v616_v56  ;;  %v619_v59 = vpop.f32.mrb[2].mxu0  ;;  %v644_v61 = vpop.f32.mrb[0].mxu1 }
  0xf8   :  { %v620_v62 = vpop.f32.mrb[3].mxu0  ;;  %v645_v1 = vpop.f32.mrb[1].mxu1 }
  0xf9   :  { %v430_v63 = vadd.f32 %v618_v58, %v105_v55  ;;  %v621_v0 = vadd.f32 %v620_v62, %v619_v59  ;;  %v646_v2 = vadd.f32 %v645_v1, %v644_v61  ;;  %v647_v3 = vpop.f32.mrb[2].mxu1 }
  0xfa   :  { %v648_v5 = vpop.f32.mrb[3].mxu1 }
  0xfb   :  { %v433_v4 = vadd.f32 %v621_v0, %v110_v60  ;;  %v649_v6 = vadd.f32 %v648_v5, %v647_v3  ;;  %v478_v7 = vadd.f32 %v646_v2, %v430_v63 }
  0xfd   :  { %v622_v8 = vpop.f32.mrb[4].mxu0  ;;  %v481_v11 = vadd.f32 %v649_v6, %v433_v4 }
  0xfe   :  { %v623_v9 = vpop.f32.mrb[5].mxu0 }
  0xff   :  { %v624_v12 = vadd.f32 %v623_v9, %v622_v8  ;;  %v625_v13 = vpop.f32.mrb[6].mxu0  ;;  %v650_v15 = vpop.f32.mrb[4].mxu1 }
 0x100   :  { %v626_v14 = vpop.f32.mrb[7].mxu0  ;;  %v651_v17 = vpop.f32.mrb[5].mxu1 }
 0x101   :  { %v438_v16 = vadd.f32 %v624_v12, %v115_v10  ;;  %v652_v18 = vadd.f32 %v651_v17, %v650_v15  ;;  %v653_v19 = vpop.f32.mrb[6].mxu1 }
 0x102   :  { %v654_v20 = vpop.f32.mrb[7].mxu1 }
 0x103   :  { %v486_v21 = vadd.f32 %v652_v18, %v438_v16 }
 0x10d   :  { %v678_v22 = vpop.f32.mrb[8].mxu0 }
 0x10e   :  { %v534_v23 = vadd.f32 %v678_v22, %v486_v21  ;;  %v525_v24 = vpop.f32.mrb[9].mxu0 }
 0x10f   :  { %v526_v25 = vadd.f32 %v525_v24, %v478_v7  ;;  %v679_v26 = vpop.f32.mrb[10].mxu0 }
 0x110   :  { %v541_v27 = vmax.f32 %v534_v23, 0.0  ;;  %v528_v28 = vpop.f32.mrb[11].mxu0 }
 0x111   :  { %v539_v29 = vmax.f32 %v526_v25, 0.0  ;;  %v529_v30 = vadd.f32 %v528_v28, %v481_v11 }
 0x112   :  { %545 = vst.msk [vmem:[%s916_s3 + $0x10] sm:$0xff] %vm542_vm2, %v541_v27 }
 0x113   :  { %543 = vst.msk [vmem:[%s916_s3] sm:$0xff] %vm542_vm2, %v539_v29  ;;  %v540_v31 = vmax.f32 %v529_v30, 0.0 }
 0x115   :  { %544 = vst.msk [vmem:[%s916_s3 + $0x8] sm:$0xff] %vm542_vm2, %v540_v31 }

// kernel: riabnet_forward.19
= control target key start
LH: loop header
LB: loop body
LE: loop exit
PB: predicated region body
PF: predicated region fallthrough
CT: control target
= control target key end

     0   :  { %v203_v1 = vmov 0   ;;  %vm92_vm0 = vcmask 785408   ;;  %vm150_vm1 = vcmask 64512   ;;  %s268_s1 = inlined_call_operand.vmem [shape: bf16[96,8], index: 1, kind: input, shape index: {}]   ;;  %s269_s0 = inlined_call_operand.vmem [shape: bf16[24,96], index: 0, kind: input, shape index: {}]   ;;  %s270_s2 = inlined_call_operand.vmem [shape: f32[24,1], index: 2, kind: input, shape index: {}]   ;;  %s271_s3 = inlined_call_operand.vmem [shape: f32[24,8], index: 3, kind: output, shape index: {}]  }
   0x1   :  { %v195_v0 = vld [vmem:[%s268_s1] sm:$0xff]   ;;  %193 = vset.pattern.permute.xlu0 %v203_v1  ;;  %194 = vset.pattern.permute.xlu1 %v203_v1  ;;  %v196_v2 = vld [vmem:[%s268_s1 + $0x8] sm:$0xff]   ;;  %v197_v3 = vld [vmem:[%s268_s1 + $0x10] sm:$0xff]  }
   0x2   :  { %176 = vmatprep.subr.bf16.mxu0 %v195_v0  ;;  %v201_v4 = vld [vmem:[%s269_s0] sm:$0xff]   ;;  %v198_v6 = vld [vmem:[%s268_s1 + $0x18] sm:$0xff]   ;;  %v32_v7 = vld [vmem:[%s270_s2 + $0x10] sm:$0xff] }
   0x3   :  { %177 = vmatpush3.bf16.msra.mxu0 %v195_v0  ;;  %v30_v5 = vld [vmem:[%s270_s2] sm:$0xff]  ;;  %188 = vmatprep.mubr.msk.bf16.mxu0 %vm92_vm0, %v201_v4  ;;  %v31_v8 = vld [vmem:[%s270_s2 + $0x8] sm:$0xff] }
   0x4   :  { %178 = vmatprep.subr.bf16.mxu0 %v196_v2  ;;  %35 = vperm.xlu0 %193, %v30_v5   ;;  %v199_v9 = vld [vmem:[%s268_s1 + $0x20] sm:$0xff]   ;;  %v200_v10 = vld [vmem:[%s268_s1 + $0x28] sm:$0xff]  }
   0x5   :  { %45 = vperm.xlu1 %194, %v32_v7   ;;  %v202_v11 = vld [vmem:[%s269_s0 + $0x8] ss:$0 sps:$4 sm:$0xff]  }
   0x7   :  { %179 = vmatpush3.bf16.msra.mxu0 %v196_v2 }
   0x8   :  { %180 = vmatprep.subr.bf16.mxu0 %v197_v3  ;;  %40 = vperm.xlu0 %193, %v31_v8  }
   0xb   :  { %181 = vmatpush3.bf16.msra.mxu0 %v197_v3 }
   0xc   :  { %182 = vmatprep.subr.bf16.mxu0 %v198_v6 }
   0xf   :  { %183 = vmatpush3.bf16.msra.mxu0 %v198_v6 }
  0x10   :  { %184 = vmatprep.subr.bf16.mxu0 %v199_v9 }
  0x13   :  { %185 = vmatpush3.bf16.msra.mxu0 %v199_v9 }
  0x14   :  { %186 = vmatprep.subr.bf16.mxu0 %v200_v10 }
  0x17   :  { %187 = vmatpush3.bf16.msra.mxu0 %v200_v10 }
  0x1a   :  { %189 = vmatmul.mubr.msk.bf16.vlgmr.msra.gmra.mrb[0].mxu0 %vm92_vm0, %v202_v11 }
  0x83   :  { %v36_v12 = vpop.permute.xlu0 %35 }
  0x84   :  { %v46_v13 = vpop.permute.xlu1 %45 }
  0x87   :  { %v41_v19 = vpop.permute.xlu0 %40 }
  0xed   :  { %v190_v14 = vpop.f32.mrb[0].mxu0 }
  0xee   :  { %v142_v15 = vadd.f32 %v190_v14, %v46_v13  ;;  %v133_v16 = vpop.f32.mrb[1].mxu0 }
  0xef   :  { %v134_v17 = vadd.f32 %v133_v16, %v36_v12  ;;  %v191_v18 = vpop.f32.mrb[2].mxu0 }
  0xf0   :  { %v149_v20 = vmax.f32 %v142_v15, 0.0  ;;  %v136_v21 = vpop.f32.mrb[3].mxu0 }
  0xf1   :  { %v147_v22 = vmax.f32 %v134_v17, 0.0  ;;  %v137_v23 = vadd.f32 %v136_v21, %v41_v19 }
  0xf2   :  { %153 = vst.msk [vmem:[%s271_s3 + $0x10] sm:$0xff] %vm150_vm1, %v149_v20 }
  0xf3   :  { %151 = vst.msk [vmem:[%s271_s3] sm:$0xff] %vm150_vm1, %v147_v22  ;;  %v148_v24 = vmax.f32 %v137_v23, 0.0 }
  0xf5   :  { %152 = vst.msk [vmem:[%s271_s3 + $0x8] sm:$0xff] %vm150_vm1, %v148_v24 }

// kernel: riabnet_forward.20
= control target key start
LH: loop header
LB: loop body
LE: loop exit
PB: predicated region body
PF: predicated region fallthrough
CT: control target
= control target key end

     0   :  { %v296_v0 = vmov 0   ;;  %vm159_vm0 = vcmask 719872   ;;  %vm166_vm1 = vcmask 1043456   ;;  %vm218_vm2 = vcmask 64512   ;;  %s418_s1 = inlined_call_operand.vmem [shape: bf16[216,8], index: 1, kind: input, shape index: {}]   ;;  %s419_s0 = inlined_call_operand.vmem [shape: bf16[24,216], index: 0, kind: input, shape index: {}]   ;;  %s420_s2 = inlined_call_operand.vmem [shape: f32[24,1], index: 2, kind: input, shape index: {}]   ;;  %s421_s3 = inlined_call_operand.vmem [shape: f32[24,8], index: 3, kind: output, shape index: {}]  }
   0x1   :  { %170 = vmatprep.subr.bf16.mxu0 %v296_v0  ;;  %246 = vmatprep.subr.bf16.mxu1 %v296_v0  ;;  %v277_v1 = vld [vmem:[%s418_s1] sm:$0xff]   ;;  %v278_v2 = vld [vmem:[%s418_s1 + $0x8] sm:$0xff]   ;;  %v279_v3 = vld [vmem:[%s418_s1 + $0x10] sm:$0xff]  }
   0x2   :  { %275 = vset.pattern.permute.xlu0 %v296_v0  ;;  %276 = vset.pattern.permute.xlu1 %v296_v0  ;;  %v280_v4 = vld [vmem:[%s418_s1 + $0x18] sm:$0xff]   ;;  %v281_v5 = vld [vmem:[%s418_s1 + $0x20] sm:$0xff]   ;;  %v17_v7 = vld [vmem:[%s419_s0 + $0x10] sm:$0xff] }
   0x3   :  { %171 = vmatpush1.bf16.msra.mxu0 %v277_v1  ;;  %260 = vmatpush1.bf16.msra.mxu1 %v277_v1  ;;  %v293_v6 = vld [vmem:[%s419_s0 + $0x4] ss:$8 sps:$4 sm:$0xff]   ;;  %v229_v9 = vcombine.high %v17_v7, %v17_v7  ;;  %v47_v10 = vld [vmem:[%s420_s2 + $0x10] sm:$0xff]  ;;  %v284_v14 = vld [vmem:[%s418_s1 + $0x38] sm:$0xff]   ;;  %v228_v23 = vcombine.low %v17_v7, %v17_v7 }
   0x4   :  { %172 = vmatprep.subr.bf16.mxu0 %v296_v0  ;;  %247 = vmatprep.subr.bf16.mxu1 %v296_v0  ;;  %v45_v8 = vld [vmem:[%s420_s2] sm:$0xff]  ;;  %v46_v11 = vld [vmem:[%s420_s2 + $0x8] sm:$0xff]  ;;  %v283_v13 = vld [vmem:[%s418_s1 + $0x30] sm:$0xff]  }
   0x5   :  { %244 = vmatprep.mubr.msk.bf16.mxu0 %vm159_vm0, %v293_v6  ;;  %50 = vperm.xlu0 %275, %v45_v8   ;;  %v282_v12 = vld [vmem:[%s418_s1 + $0x28] sm:$0xff]   ;;  %v285_v15 = vld [vmem:[%s418_s1 + $0x40] sm:$0xff]   ;;  %v287_v17 = vld [vmem:[%s418_s1 + $0x50] sm:$0xff]  }
   0x6   :  { %60 = vperm.xlu1 %276, %v47_v10   ;;  %245 = vmatprep.mubr.msk.bf16.mxu1 %vm159_vm0, %v229_v9  ;;  %v286_v16 = vld [vmem:[%s418_s1 + $0x48] sm:$0xff]   ;;  %v288_v18 = vld [vmem:[%s418_s1 + $0x58] sm:$0xff]   ;;  %v289_v19 = vld [vmem:[%s418_s1 + $0x60] sm:$0xff]  }
   0x7   :  { %173 = vmatpush1.bf16.msra.mxu0 %v278_v2  ;;  %261 = vmatpush1.bf16.msra.mxu1 %v278_v2  ;;  %v290_v20 = vld [vmem:[%s418_s1 + $0x68] ss:$0 sps:$4 sm:$0xff]  }
   0x8   :  { %174 = vmatprep.subr.bf16.mxu0 %v296_v0  ;;  %248 = vmatprep.subr.bf16.mxu1 %v296_v0  ;;  %v168_v21 = vsel %vm166_vm1, %v290_v20, 0  ;;  %v291_v22 = vld [vmem:[%s419_s0] ss:$8 sps:$4 sm:$0xff]  }
   0x9   :  { %55 = vperm.xlu0 %275, %v46_v11  }
   0xb   :  { %175 = vmatpush1.bf16.msra.mxu0 %v279_v3  ;;  %262 = vmatpush1.bf16.msra.mxu1 %v279_v3 }
   0xc   :  { %176 = vmatprep.subr.bf16.mxu0 %v296_v0  ;;  %249 = vmatprep.subr.bf16.mxu1 %v296_v0 }
   0xf   :  { %177 = vmatpush1.bf16.msra.mxu0 %v280_v4  ;;  %263 = vmatpush1.bf16.msra.mxu1 %v280_v4 }
  0x10   :  { %178 = vmatprep.subr.bf16.mxu0 %v296_v0  ;;  %250 = vmatprep.subr.bf16.mxu1 %v296_v0 }
  0x13   :  { %179 = vmatpush1.bf16.msra.mxu0 %v281_v5  ;;  %264 = vmatpush1.bf16.msra.mxu1 %v281_v5 }
  0x14   :  { %180 = vmatprep.subr.bf16.mxu0 %v296_v0  ;;  %251 = vmatprep.subr.bf16.mxu1 %v296_v0 }
  0x17   :  { %181 = vmatpush1.bf16.msra.mxu0 %v282_v12  ;;  %265 = vmatpush1.bf16.msra.mxu1 %v282_v12 }
  0x18   :  { %182 = vmatprep.subr.bf16.mxu0 %v296_v0  ;;  %252 = vmatprep.subr.bf16.mxu1 %v296_v0 }
  0x1b   :  { %183 = vmatpush1.bf16.msra.mxu0 %v283_v13  ;;  %266 = vmatpush1.bf16.msra.mxu1 %v283_v13 }
  0x1c   :  { %184 = vmatprep.subr.bf16.mxu0 %v296_v0  ;;  %253 = vmatprep.subr.bf16.mxu1 %v296_v0 }
  0x1f   :  { %185 = vmatpush1.bf16.msra.mxu0 %v284_v14  ;;  %267 = vmatpush1.bf16.msra.mxu1 %v284_v14 }
  0x20   :  { %186 = vmatprep.subr.bf16.mxu0 %v296_v0  ;;  %254 = vmatprep.subr.bf16.mxu1 %v296_v0 }
  0x23   :  { %187 = vmatpush1.bf16.msra.mxu0 %v285_v15  ;;  %268 = vmatpush1.bf16.msra.mxu1 %v285_v15 }
  0x24   :  { %188 = vmatprep.subr.bf16.mxu0 %v296_v0  ;;  %255 = vmatprep.subr.bf16.mxu1 %v296_v0 }
  0x27   :  { %189 = vmatpush1.bf16.msra.mxu0 %v286_v16  ;;  %269 = vmatpush1.bf16.msra.mxu1 %v286_v16 }
  0x28   :  { %190 = vmatprep.subr.bf16.mxu0 %v296_v0  ;;  %256 = vmatprep.subr.bf16.mxu1 %v296_v0 }
  0x2b   :  { %191 = vmatpush1.bf16.msra.mxu0 %v287_v17  ;;  %270 = vmatpush1.bf16.msra.mxu1 %v287_v17 }
  0x2c   :  { %192 = vmatprep.subr.bf16.mxu0 %v296_v0  ;;  %257 = vmatprep.subr.bf16.mxu1 %v296_v0 }
  0x2f   :  { %193 = vmatpush1.bf16.msra.mxu0 %v288_v18  ;;  %271 = vmatpush1.bf16.msra.mxu1 %v288_v18 }
  0x30   :  { %194 = vmatprep.subr.bf16.mxu0 %v296_v0  ;;  %258 = vmatprep.subr.bf16.mxu1 %v296_v0 }
  0x33   :  { %195 = vmatpush1.bf16.msra.mxu0 %v289_v19  ;;  %272 = vmatpush1.bf16.msra.mxu1 %v289_v19 }
  0x34   :  { %196 = vmatprep.subr.bf16.mxu0 %v296_v0  ;;  %259 = vmatprep.subr.bf16.mxu1 %v296_v0 }
  0x37   :  { %197 = vmatpush1.bf16.msra.mxu0 %v168_v21  ;;  %273 = vmatpush1.bf16.msra.mxu1 %v168_v21 }
  0x3a   :  { %203 = vmatmul.mubr.bf16.vlgmr.msra.gmra.mrb[0].mxu0 %v291_v22  ;;  %211 = vmatmul.mubr.bf16.vlgmr.msra.gmra.mrb[0].mxu1 %v228_v23 }
  0x84   :  { %v51_v24 = vpop.permute.xlu0 %50 }
  0x85   :  { %v61_v25 = vpop.permute.xlu1 %60 }
  0x88   :  { %v56_v26 = vpop.permute.xlu0 %55 }
 0x10d   :  { %v204_v27 = vpop.f32.mrb[0].mxu0  ;;  %v212_v28 = vpop.f32.mrb[0].mxu1 }
 0x10e   :  { %v205_v29 = vadd.f32 %v204_v27, %v51_v24  ;;  %v206_v30 = vpop.f32.mrb[1].mxu0  ;;  %v214_v31 = vpop.f32.mrb[1].mxu1  ;;  %v213_v32 = vadd.f32 %v212_v28, %v61_v25 }
 0x10f   :  { %v207_v33 = vpop.f32.mrb[2].mxu0  ;;  %v215_v34 = vpop.f32.mrb[2].mxu1 }
 0x110   :  { %219 = vst.msk [vmem:[%s421_s3] sm:$0xff] %vm218_vm2, %v205_v29  ;;  %221 = vst.msk [vmem:[%s421_s3 + $0x10] sm:$0xff] %vm218_vm2, %v213_v32  ;;  %v208_v35 = vadd.f32 %v207_v33, %v56_v26  ;;  %v209_v36 = vpop.f32.mrb[3].mxu0  ;;  %v216_v37 = vpop.f32.mrb[3].mxu1 }
 0x112   :  { %220 = vst.msk [vmem:[%s421_s3 + $0x8] sm:$0xff] %vm218_vm2, %v208_v35 }

// kernel: riabnet_forward.21
= control target key start
LH: loop header
LB: loop body
LE: loop exit
PB: predicated region body
PF: predicated region fallthrough
CT: control target
= control target key end

     0   :  { %v240_v0 = vmov 0   ;;  %vm146_vm0 = vcmask 719872   ;;  %vm150_vm1 = vcmask 1043456   ;;  %vm197_vm2 = vcmask 15360   ;;  %s321_s1 = inlined_call_operand.vmem [shape: bf16[216,2], index: 1, kind: input, shape index: {}]   ;;  %s322_s0 = inlined_call_operand.vmem [shape: bf16[16,216], index: 0, kind: input, shape index: {}]   ;;  %s323_s2 = inlined_call_operand.vmem [shape: f32[16,1], index: 2, kind: input, shape index: {}]   ;;  %s324_s3 = inlined_call_operand.vmem [shape: f32[16,2], index: 3, kind: output, shape index: {}]  }
   0x1   :  { %154 = vmatprep.subr.bf16.mxu0 %v240_v0  ;;  %v223_v1 = vld [vmem:[%s321_s1] sm:$0xff]   ;;  %222 = vset.pattern.permute.xlu0 %v240_v0  ;;  %v224_v2 = vld [vmem:[%s321_s1 + $0x8] sm:$0xff]   ;;  %v225_v3 = vld [vmem:[%s321_s1 + $0x10] sm:$0xff]  }
   0x2   :  { %155 = vmatpush1.bf16.msra.mxu0 %v223_v1  ;;  %v226_v4 = vld [vmem:[%s321_s1 + $0x18] sm:$0xff]   ;;  %v227_v5 = vld [vmem:[%s321_s1 + $0x20] sm:$0xff]   ;;  %v45_v8 = vld [vmem:[%s323_s2 + $0x8] sm:$0xff] }
   0x3   :  { %156 = vmatprep.subr.bf16.mxu0 %v240_v0  ;;  %v239_v6 = vld [vmem:[%s322_s0 + $0x4] ss:$8 sps:$4 sm:$0xff]   ;;  %v229_v10 = vld [vmem:[%s321_s1 + $0x30] sm:$0xff]   ;;  %v230_v11 = vld [vmem:[%s321_s1 + $0x38] sm:$0xff]  }
   0x4   :  { %v44_v7 = vld [vmem:[%s323_s2] sm:$0xff]  ;;  %220 = vmatprep.mubr.msk.bf16.mxu0 %vm146_vm0, %v239_v6  ;;  %v228_v9 = vld [vmem:[%s321_s1 + $0x28] sm:$0xff]   ;;  %v233_v14 = vld [vmem:[%s321_s1 + $0x50] sm:$0xff]  }
   0x5   :  { %48 = vperm.xlu0 %222, %v44_v7   ;;  %v231_v12 = vld [vmem:[%s321_s1 + $0x40] sm:$0xff]   ;;  %v232_v13 = vld [vmem:[%s321_s1 + $0x48] sm:$0xff]   ;;  %v234_v15 = vld [vmem:[%s321_s1 + $0x58] sm:$0xff]  }
   0x6   :  { %157 = vmatpush1.bf16.msra.mxu0 %v224_v2  ;;  %v235_v16 = vld [vmem:[%s321_s1 + $0x60] sm:$0xff]   ;;  %v236_v17 = vld [vmem:[%s321_s1 + $0x68] ss:$0 sps:$4 sm:$0xff]  }
   0x7   :  { %158 = vmatprep.subr.bf16.mxu0 %v240_v0  ;;  %v152_v18 = vsel %vm150_vm1, %v236_v17, 0  ;;  %v237_v19 = vld [vmem:[%s322_s0] ss:$8 sps:$4 sm:$0xff]  }
   0x9   :  { %53 = vperm.xlu0 %222, %v45_v8  }
   0xa   :  { %159 = vmatpush1.bf16.msra.mxu0 %v225_v3 }
   0xb   :  { %160 = vmatprep.subr.bf16.mxu0 %v240_v0 }
   0xe   :  { %161 = vmatpush1.bf16.msra.mxu0 %v226_v4 }
   0xf   :  { %162 = vmatprep.subr.bf16.mxu0 %v240_v0 }
  0x12   :  { %163 = vmatpush1.bf16.msra.mxu0 %v227_v5 }
  0x13   :  { %164 = vmatprep.subr.bf16.mxu0 %v240_v0 }
  0x16   :  { %165 = vmatpush1.bf16.msra.mxu0 %v228_v9 }
  0x17   :  { %166 = vmatprep.subr.bf16.mxu0 %v240_v0 }
  0x1a   :  { %167 = vmatpush1.bf16.msra.mxu0 %v229_v10 }
  0x1b   :  { %168 = vmatprep.subr.bf16.mxu0 %v240_v0 }
  0x1e   :  { %169 = vmatpush1.bf16.msra.mxu0 %v230_v11 }
  0x1f   :  { %170 = vmatprep.subr.bf16.mxu0 %v240_v0 }
  0x22   :  { %171 = vmatpush1.bf16.msra.mxu0 %v231_v12 }
  0x23   :  { %172 = vmatprep.subr.bf16.mxu0 %v240_v0 }
  0x26   :  { %173 = vmatpush1.bf16.msra.mxu0 %v232_v13 }
  0x27   :  { %174 = vmatprep.subr.bf16.mxu0 %v240_v0 }
  0x2a   :  { %175 = vmatpush1.bf16.msra.mxu0 %v233_v14 }
  0x2b   :  { %176 = vmatprep.subr.bf16.mxu0 %v240_v0 }
  0x2e   :  { %177 = vmatpush1.bf16.msra.mxu0 %v234_v15 }
  0x2f   :  { %178 = vmatprep.subr.bf16.mxu0 %v240_v0 }
  0x32   :  { %179 = vmatpush1.bf16.msra.mxu0 %v235_v16 }
  0x33   :  { %180 = vmatprep.subr.bf16.mxu0 %v240_v0 }
  0x36   :  { %181 = vmatpush1.bf16.msra.mxu0 %v152_v18 }
  0x39   :  { %187 = vmatmul.mubr.bf16.vlgmr.msra.gmra.mrb[0].mxu0 %v237_v19 }
  0x84   :  { %v49_v20 = vpop.permute.xlu0 %48 }
  0x88   :  { %v54_v24 = vpop.permute.xlu0 %53 }
 0x10c   :  { %v188_v21 = vpop.f32.mrb[0].mxu0 }
 0x10d   :  { %v189_v22 = vadd.f32 %v188_v21, %v49_v20  ;;  %v190_v23 = vpop.f32.mrb[1].mxu0 }
 0x10e   :  { %v191_v25 = vpop.f32.mrb[2].mxu0 }
 0x10f   :  { %v195_v26 = vmax.f32 %v189_v22, 0.0  ;;  %v192_v27 = vadd.f32 %v191_v25, %v54_v24  ;;  %v193_v28 = vpop.f32.mrb[3].mxu0 }
 0x111   :  { %198 = vst.msk [vmem:[%s324_s3] sm:$0xff] %vm197_vm2, %v195_v26  ;;  %v196_v29 = vmax.f32 %v192_v27, 0.0 }
 0x113   :  { %199 = vst.msk [vmem:[%s324_s3 + $0x8] sm:$0xff] %vm197_vm2, %v196_v29 }

// kernel: riabnet_forward.22
= control target key start
LH: loop header
LB: loop body
LE: loop exit
PB: predicated region body
PF: predicated region fallthrough
CT: control target
= control target key end

     0   :  { %vm26_vm0 = vcmask 1041408   ;;  %vm22_vm1 = vcmask 15360   ;;  %v119_v0 = vmov 0.0   ;;  %vm120_vm2 = vmmov 0   ;;  %s154_s1 = inlined_call_operand.vmem [shape: f32[2,16], index: 1, kind: input, shape index: {}]   ;;  %s155_s0 = inlined_call_operand.vmem [shape: f32[2,2], index: 0, kind: input, shape index: {}]   ;;  %s156_s2 = inlined_call_operand.vmem [shape: f32[2,1], index: 2, kind: input, shape index: {}]   ;;  %s157_s3 = inlined_call_operand.vmem [shape: f32[2,16], index: 3, kind: output, shape index: {}]  }
   0x1   :  { %110 = vmatprep.subr.mxu0 %v119_v0  ;;  %v15_v1 = vld [vmem:[%s154_s1] sm:$0x3]  ;;  %112 = vmatprep.mubr.msk.f32.mxu0 %vm120_vm2, %v119_v0  ;;  %v121_v3 = vmov 0   ;;  %vm100_vm3 = vcmask 123904  }
   0x2   :  { %v14_v2 = vld [vmem:[%s155_s0] sm:$0x3]  ;;  %111 = vmatpush3.msk.msra.mxu0 %vm26_vm0, %v15_v1  ;;  %118 = vset.pattern.permute.xlu0 %v121_v3 }
   0x3   :  { %v16_v4 = vld [vmem:[%s156_s2] sm:$0x3]  ;;  %113 = vmatmul.mubr.msk.f32.vlgmr.msra.gmra.mrb[0].mxu0 %vm22_vm1, %v14_v2 }
   0x4   :  { %19 = vperm.xlu0 %118, %v16_v4  }
  0x83   :  { %v20_v5 = vpop.permute.xlu0 %19 }
  0xd6   :  { %v96_v6 = vpop.f32.mrb[0].mxu0 }
  0xd7   :  { %v97_v7 = vadd.f32 %v96_v6, %v20_v5  ;;  %v114_v8 = vpop.f32.mrb[1].mxu0 }
  0xd9   :  { %101 = vst.msk [vmem:[%s157_s3] sm:$0x3] %vm100_vm3, %v97_v7 }

// kernel: riabnet_forward.23
= control target key start
LH: loop header
LB: loop body
LE: loop exit
PB: predicated region body
PF: predicated region fallthrough
CT: control target
= control target key end

     0   :  { %v239_v0 = vmov 0   ;;  %vm123_vm0 = vcmask 130048   ;;  %vm181_vm1 = vcmask 146432   ;;  %s314_s1 = inlined_call_operand.vmem [shape: bf16[144,18], index: 1, kind: input, shape index: {}]   ;;  %s315_s0 = inlined_call_operand.vmem [shape: bf16[24,144], index: 0, kind: input, shape index: {}]   ;;  %s316_s2 = inlined_call_operand.vmem [shape: f32[24,1], index: 2, kind: input, shape index: {}]   ;;  %s317_s3 = inlined_call_operand.vmem [shape: f32[24,18], index: 3, kind: output, shape index: {}]  }
   0x1   :  { %130 = vmatprep.subr.bf16.mxu0 %v239_v0  ;;  %204 = vmatprep.subr.bf16.mxu1 %v239_v0  ;;  %v225_v1 = vld [vmem:[%s314_s1] sm:$0xff]   ;;  %v226_v2 = vld [vmem:[%s314_s1 + $0x8] sm:$0xff]   ;;  %v227_v3 = vld [vmem:[%s314_s1 + $0x10] sm:$0xff]  }
   0x2   :  { %223 = vset.pattern.permute.xlu0 %v239_v0  ;;  %224 = vset.pattern.permute.xlu1 %v239_v0  ;;  %v228_v4 = vld [vmem:[%s314_s1 + $0x18] sm:$0xff]   ;;  %v236_v5 = vld [vmem:[%s315_s0 + $0x4] ss:$8 sps:$4 sm:$0xff]   ;;  %v17_v6 = vld [vmem:[%s315_s0 + $0x10] sm:$0xff] }
   0x3   :  { %131 = vmatpush1.bf16.msra.mxu0 %v225_v1  ;;  %213 = vmatpush1.bf16.msra.mxu1 %v225_v1  ;;  %v36_v7 = vld [vmem:[%s316_s2] sm:$0xff]  ;;  %v192_v8 = vcombine.high %v17_v6, %v17_v6  ;;  %v38_v9 = vld [vmem:[%s316_s2 + $0x10] sm:$0xff]  ;;  %v37_v10 = vld [vmem:[%s316_s2 + $0x8] sm:$0xff]  ;;  %v191_v17 = vcombine.low %v17_v6, %v17_v6 }
   0x4   :  { %132 = vmatprep.subr.bf16.mxu0 %v239_v0  ;;  %205 = vmatprep.subr.bf16.mxu1 %v239_v0  ;;  %v229_v11 = vld [vmem:[%s314_s1 + $0x20] sm:$0xff]   ;;  %v230_v12 = vld [vmem:[%s314_s1 + $0x28] sm:$0xff]   ;;  %v231_v13 = vld [vmem:[%s314_s1 + $0x30] sm:$0xff]  }
   0x5   :  { %202 = vmatprep.mubr.msk.bf16.mxu0 %vm123_vm0, %v236_v5  ;;  %41 = vperm.xlu0 %223, %v36_v7   ;;  %v232_v14 = vld [vmem:[%s314_s1 + $0x38] sm:$0xff]   ;;  %v233_v15 = vld [vmem:[%s314_s1 + $0x40] sm:$0xff]  }
   0x6   :  { %203 = vmatprep.mubr.msk.bf16.mxu1 %vm123_vm0, %v192_v8  ;;  %51 = vperm.xlu1 %224, %v38_v9   ;;  %v234_v16 = vld [vmem:[%s315_s0] ss:$8 sps:$4 sm:$0xff]  }
   0x7   :  { %133 = vmatpush1.bf16.msra.mxu0 %v226_v2  ;;  %214 = vmatpush1.bf16.msra.mxu1 %v226_v2 }
   0x8   :  { %134 = vmatprep.subr.bf16.mxu0 %v239_v0  ;;  %206 = vmatprep.subr.bf16.mxu1 %v239_v0 }
   0x9   :  { %46 = vperm.xlu0 %223, %v37_v10  }
   0xb   :  { %135 = vmatpush1.bf16.msra.mxu0 %v227_v3  ;;  %215 = vmatpush1.bf16.msra.mxu1 %v227_v3 }
   0xc   :  { %136 = vmatprep.subr.bf16.mxu0 %v239_v0  ;;  %207 = vmatprep.subr.bf16.mxu1 %v239_v0 }
   0xf   :  { %137 = vmatpush1.bf16.msra.mxu0 %v228_v4  ;;  %216 = vmatpush1.bf16.msra.mxu1 %v228_v4 }
  0x10   :  { %138 = vmatprep.subr.bf16.mxu0 %v239_v0  ;;  %208 = vmatprep.subr.bf16.mxu1 %v239_v0 }
  0x13   :  { %139 = vmatpush1.bf16.msra.mxu0 %v229_v11  ;;  %217 = vmatpush1.bf16.msra.mxu1 %v229_v11 }
  0x14   :  { %140 = vmatprep.subr.bf16.mxu0 %v239_v0  ;;  %209 = vmatprep.subr.bf16.mxu1 %v239_v0 }
  0x17   :  { %141 = vmatpush1.bf16.msra.mxu0 %v230_v12  ;;  %218 = vmatpush1.bf16.msra.mxu1 %v230_v12 }
  0x18   :  { %142 = vmatprep.subr.bf16.mxu0 %v239_v0  ;;  %210 = vmatprep.subr.bf16.mxu1 %v239_v0 }
  0x1b   :  { %143 = vmatpush1.bf16.msra.mxu0 %v231_v13  ;;  %219 = vmatpush1.bf16.msra.mxu1 %v231_v13 }
  0x1c   :  { %144 = vmatprep.subr.bf16.mxu0 %v239_v0  ;;  %211 = vmatprep.subr.bf16.mxu1 %v239_v0 }
  0x1f   :  { %145 = vmatpush1.bf16.msra.mxu0 %v232_v14  ;;  %220 = vmatpush1.bf16.msra.mxu1 %v232_v14 }
  0x20   :  { %146 = vmatprep.subr.bf16.mxu0 %v239_v0  ;;  %212 = vmatprep.subr.bf16.mxu1 %v239_v0 }
  0x23   :  { %147 = vmatpush1.bf16.msra.mxu0 %v233_v15  ;;  %221 = vmatpush1.bf16.msra.mxu1 %v233_v15 }
  0x26   :  { %163 = vmatmul.mubr.bf16.vlgmr.msra.gmra.mrb[0].mxu0 %v234_v16  ;;  %171 = vmatmul.mubr.bf16.vlgmr.msra.gmra.mrb[0].mxu1 %v191_v17 }
  0x84   :  { %v42_v18 = vpop.permute.xlu0 %41 }
  0x85   :  { %v52_v19 = vpop.permute.xlu1 %51 }
  0x88   :  { %v47_v20 = vpop.permute.xlu0 %46 }
  0xf9   :  { %v164_v21 = vpop.f32.mrb[0].mxu0  ;;  %v172_v22 = vpop.f32.mrb[0].mxu1 }
  0xfa   :  { %v165_v23 = vadd.f32 %v164_v21, %v42_v18  ;;  %v166_v24 = vpop.f32.mrb[1].mxu0  ;;  %v174_v25 = vpop.f32.mrb[1].mxu1  ;;  %v173_v26 = vadd.f32 %v172_v22, %v52_v19 }
  0xfb   :  { %v167_v27 = vpop.f32.mrb[2].mxu0  ;;  %v175_v28 = vpop.f32.mrb[2].mxu1 }
  0xfc   :  { %v178_v29 = vmax.f32 %v165_v23, 0.0  ;;  %v180_v30 = vmax.f32 %v173_v26, 0.0  ;;  %v168_v31 = vadd.f32 %v167_v27, %v47_v20  ;;  %v169_v32 = vpop.f32.mrb[3].mxu0  ;;  %v176_v33 = vpop.f32.mrb[3].mxu1 }
  0xfe   :  { %182 = vst.msk [vmem:[%s317_s3] sm:$0xff] %vm181_vm1, %v178_v29  ;;  %184 = vst.msk [vmem:[%s317_s3 + $0x10] sm:$0xff] %vm181_vm1, %v180_v30  ;;  %v179_v34 = vmax.f32 %v168_v31, 0.0 }
 0x100   :  { %183 = vst.msk [vmem:[%s317_s3 + $0x8] sm:$0xff] %vm181_vm1, %v179_v34 }

// kernel: riabnet_forward.24
= control target key start
LH: loop header
LB: loop body
LE: loop exit
PB: predicated region body
PF: predicated region fallthrough
CT: control target
= control target key end

     0   :  { %v299_v0 = vmov 0   ;;  %vm159_vm0 = vcmask 719872   ;;  %vm166_vm1 = vcmask 1043456   ;;  %vm221_vm2 = vcmask 261120   ;;  %s421_s1 = inlined_call_operand.vmem [shape: bf16[216,32], index: 1, kind: input, shape index: {}]   ;;  %s422_s0 = inlined_call_operand.vmem [shape: bf16[24,216], index: 0, kind: input, shape index: {}]   ;;  %s423_s2 = inlined_call_operand.vmem [shape: f32[24,1], index: 2, kind: input, shape index: {}]   ;;  %s424_s3 = inlined_call_operand.vmem [shape: f32[24,32], index: 3, kind: output, shape index: {}]  }
   0x1   :  { %170 = vmatprep.subr.bf16.mxu0 %v299_v0  ;;  %249 = vmatprep.subr.bf16.mxu1 %v299_v0  ;;  %v280_v1 = vld [vmem:[%s421_s1] sm:$0xff]   ;;  %v281_v2 = vld [vmem:[%s421_s1 + $0x8] sm:$0xff]   ;;  %v282_v3 = vld [vmem:[%s421_s1 + $0x10] sm:$0xff]  }
   0x2   :  { %278 = vset.pattern.permute.xlu0 %v299_v0  ;;  %279 = vset.pattern.permute.xlu1 %v299_v0  ;;  %v283_v4 = vld [vmem:[%s421_s1 + $0x18] sm:$0xff]   ;;  %v284_v5 = vld [vmem:[%s421_s1 + $0x20] sm:$0xff]   ;;  %v17_v7 = vld [vmem:[%s422_s0 + $0x10] sm:$0xff] }
   0x3   :  { %171 = vmatpush1.bf16.msra.mxu0 %v280_v1  ;;  %263 = vmatpush1.bf16.msra.mxu1 %v280_v1  ;;  %v296_v6 = vld [vmem:[%s422_s0 + $0x4] ss:$8 sps:$4 sm:$0xff]   ;;  %v232_v9 = vcombine.high %v17_v7, %v17_v7  ;;  %v47_v10 = vld [vmem:[%s423_s2 + $0x10] sm:$0xff]  ;;  %v287_v14 = vld [vmem:[%s421_s1 + $0x38] sm:$0xff]   ;;  %v231_v23 = vcombine.low %v17_v7, %v17_v7 }
   0x4   :  { %172 = vmatprep.subr.bf16.mxu0 %v299_v0  ;;  %250 = vmatprep.subr.bf16.mxu1 %v299_v0  ;;  %v45_v8 = vld [vmem:[%s423_s2] sm:$0xff]  ;;  %v46_v11 = vld [vmem:[%s423_s2 + $0x8] sm:$0xff]  ;;  %v286_v13 = vld [vmem:[%s421_s1 + $0x30] sm:$0xff]  }
   0x5   :  { %247 = vmatprep.mubr.msk.bf16.mxu0 %vm159_vm0, %v296_v6  ;;  %50 = vperm.xlu0 %278, %v45_v8   ;;  %v285_v12 = vld [vmem:[%s421_s1 + $0x28] sm:$0xff]   ;;  %v288_v15 = vld [vmem:[%s421_s1 + $0x40] sm:$0xff]   ;;  %v290_v17 = vld [vmem:[%s421_s1 + $0x50] sm:$0xff]  }
   0x6   :  { %60 = vperm.xlu1 %279, %v47_v10   ;;  %248 = vmatprep.mubr.msk.bf16.mxu1 %vm159_vm0, %v232_v9  ;;  %v289_v16 = vld [vmem:[%s421_s1 + $0x48] sm:$0xff]   ;;  %v291_v18 = vld [vmem:[%s421_s1 + $0x58] sm:$0xff]   ;;  %v292_v19 = vld [vmem:[%s421_s1 + $0x60] sm:$0xff]  }
   0x7   :  { %173 = vmatpush1.bf16.msra.mxu0 %v281_v2  ;;  %264 = vmatpush1.bf16.msra.mxu1 %v281_v2  ;;  %v293_v20 = vld [vmem:[%s421_s1 + $0x68] ss:$0 sps:$4 sm:$0xff]  }
   0x8   :  { %174 = vmatprep.subr.bf16.mxu0 %v299_v0  ;;  %251 = vmatprep.subr.bf16.mxu1 %v299_v0  ;;  %v168_v21 = vsel %vm166_vm1, %v293_v20, 0  ;;  %v294_v22 = vld [vmem:[%s422_s0] ss:$8 sps:$4 sm:$0xff]  }
   0x9   :  { %55 = vperm.xlu0 %278, %v46_v11  }
   0xb   :  { %175 = vmatpush1.bf16.msra.mxu0 %v282_v3  ;;  %265 = vmatpush1.bf16.msra.mxu1 %v282_v3 }
   0xc   :  { %176 = vmatprep.subr.bf16.mxu0 %v299_v0  ;;  %252 = vmatprep.subr.bf16.mxu1 %v299_v0 }
   0xf   :  { %177 = vmatpush1.bf16.msra.mxu0 %v283_v4  ;;  %266 = vmatpush1.bf16.msra.mxu1 %v283_v4 }
  0x10   :  { %178 = vmatprep.subr.bf16.mxu0 %v299_v0  ;;  %253 = vmatprep.subr.bf16.mxu1 %v299_v0 }
  0x13   :  { %179 = vmatpush1.bf16.msra.mxu0 %v284_v5  ;;  %267 = vmatpush1.bf16.msra.mxu1 %v284_v5 }
  0x14   :  { %180 = vmatprep.subr.bf16.mxu0 %v299_v0  ;;  %254 = vmatprep.subr.bf16.mxu1 %v299_v0 }
  0x17   :  { %181 = vmatpush1.bf16.msra.mxu0 %v285_v12  ;;  %268 = vmatpush1.bf16.msra.mxu1 %v285_v12 }
  0x18   :  { %182 = vmatprep.subr.bf16.mxu0 %v299_v0  ;;  %255 = vmatprep.subr.bf16.mxu1 %v299_v0 }
  0x1b   :  { %183 = vmatpush1.bf16.msra.mxu0 %v286_v13  ;;  %269 = vmatpush1.bf16.msra.mxu1 %v286_v13 }
  0x1c   :  { %184 = vmatprep.subr.bf16.mxu0 %v299_v0  ;;  %256 = vmatprep.subr.bf16.mxu1 %v299_v0 }
  0x1f   :  { %185 = vmatpush1.bf16.msra.mxu0 %v287_v14  ;;  %270 = vmatpush1.bf16.msra.mxu1 %v287_v14 }
  0x20   :  { %186 = vmatprep.subr.bf16.mxu0 %v299_v0  ;;  %257 = vmatprep.subr.bf16.mxu1 %v299_v0 }
  0x23   :  { %187 = vmatpush1.bf16.msra.mxu0 %v288_v15  ;;  %271 = vmatpush1.bf16.msra.mxu1 %v288_v15 }
  0x24   :  { %188 = vmatprep.subr.bf16.mxu0 %v299_v0  ;;  %258 = vmatprep.subr.bf16.mxu1 %v299_v0 }
  0x27   :  { %189 = vmatpush1.bf16.msra.mxu0 %v289_v16  ;;  %272 = vmatpush1.bf16.msra.mxu1 %v289_v16 }
  0x28   :  { %190 = vmatprep.subr.bf16.mxu0 %v299_v0  ;;  %259 = vmatprep.subr.bf16.mxu1 %v299_v0 }
  0x2b   :  { %191 = vmatpush1.bf16.msra.mxu0 %v290_v17  ;;  %273 = vmatpush1.bf16.msra.mxu1 %v290_v17 }
  0x2c   :  { %192 = vmatprep.subr.bf16.mxu0 %v299_v0  ;;  %260 = vmatprep.subr.bf16.mxu1 %v299_v0 }
  0x2f   :  { %193 = vmatpush1.bf16.msra.mxu0 %v291_v18  ;;  %274 = vmatpush1.bf16.msra.mxu1 %v291_v18 }
  0x30   :  { %194 = vmatprep.subr.bf16.mxu0 %v299_v0  ;;  %261 = vmatprep.subr.bf16.mxu1 %v299_v0 }
  0x33   :  { %195 = vmatpush1.bf16.msra.mxu0 %v292_v19  ;;  %275 = vmatpush1.bf16.msra.mxu1 %v292_v19 }
  0x34   :  { %196 = vmatprep.subr.bf16.mxu0 %v299_v0  ;;  %262 = vmatprep.subr.bf16.mxu1 %v299_v0 }
  0x37   :  { %197 = vmatpush1.bf16.msra.mxu0 %v168_v21  ;;  %276 = vmatpush1.bf16.msra.mxu1 %v168_v21 }
  0x3a   :  { %203 = vmatmul.mubr.bf16.vlgmr.msra.gmra.mrb[0].mxu0 %v294_v22  ;;  %211 = vmatmul.mubr.bf16.vlgmr.msra.gmra.mrb[0].mxu1 %v231_v23 }
  0x84   :  { %v51_v24 = vpop.permute.xlu0 %50 }
  0x85   :  { %v61_v25 = vpop.permute.xlu1 %60 }
  0x88   :  { %v56_v26 = vpop.permute.xlu0 %55 }
 0x10d   :  { %v204_v27 = vpop.f32.mrb[0].mxu0  ;;  %v212_v28 = vpop.f32.mrb[0].mxu1 }
 0x10e   :  { %v205_v29 = vadd.f32 %v204_v27, %v51_v24  ;;  %v206_v30 = vpop.f32.mrb[1].mxu0  ;;  %v214_v31 = vpop.f32.mrb[1].mxu1  ;;  %v213_v32 = vadd.f32 %v212_v28, %v61_v25 }
 0x10f   :  { %v207_v33 = vpop.f32.mrb[2].mxu0  ;;  %v215_v34 = vpop.f32.mrb[2].mxu1 }
 0x110   :  { %v218_v35 = vmax.f32 %v205_v29, 0.0  ;;  %v220_v36 = vmax.f32 %v213_v32, 0.0  ;;  %v208_v37 = vadd.f32 %v207_v33, %v56_v26  ;;  %v209_v38 = vpop.f32.mrb[3].mxu0  ;;  %v216_v39 = vpop.f32.mrb[3].mxu1 }
 0x112   :  { %222 = vst.msk [vmem:[%s424_s3] sm:$0xff] %vm221_vm2, %v218_v35  ;;  %224 = vst.msk [vmem:[%s424_s3 + $0x10] sm:$0xff] %vm221_vm2, %v220_v36  ;;  %v219_v40 = vmax.f32 %v208_v37, 0.0 }
 0x114   :  { %223 = vst.msk [vmem:[%s424_s3 + $0x8] sm:$0xff] %vm221_vm2, %v219_v40 }

// kernel: riabnet_forward.25
= control target key start
LH: loop header
LB: loop body
LE: loop exit
PB: predicated region body
PF: predicated region fallthrough
CT: control target
= control target key end

     0   :  { %v200_v1 = vmov 0   ;;  %vm92_vm0 = vcmask 785408   ;;  %vm147_vm1 = vcmask 146432   ;;  %s265_s1 = inlined_call_operand.vmem [shape: bf16[96,18], index: 1, kind: input, shape index: {}]   ;;  %s266_s0 = inlined_call_operand.vmem [shape: bf16[24,96], index: 0, kind: input, shape index: {}]   ;;  %s267_s2 = inlined_call_operand.vmem [shape: f32[24,1], index: 2, kind: input, shape index: {}]   ;;  %s268_s3 = inlined_call_operand.vmem [shape: f32[24,18], index: 3, kind: output, shape index: {}]  }
   0x1   :  { %v192_v0 = vld [vmem:[%s265_s1] sm:$0xff]   ;;  %190 = vset.pattern.permute.xlu0 %v200_v1  ;;  %191 = vset.pattern.permute.xlu1 %v200_v1  ;;  %v193_v2 = vld [vmem:[%s265_s1 + $0x8] sm:$0xff]   ;;  %v194_v3 = vld [vmem:[%s265_s1 + $0x10] sm:$0xff]  }
   0x2   :  { %173 = vmatprep.subr.bf16.mxu0 %v192_v0  ;;  %v198_v4 = vld [vmem:[%s266_s0] sm:$0xff]   ;;  %v195_v6 = vld [vmem:[%s265_s1 + $0x18] sm:$0xff]   ;;  %v32_v7 = vld [vmem:[%s267_s2 + $0x10] sm:$0xff] }
   0x3   :  { %174 = vmatpush3.bf16.msra.mxu0 %v192_v0  ;;  %v30_v5 = vld [vmem:[%s267_s2] sm:$0xff]  ;;  %185 = vmatprep.mubr.msk.bf16.mxu0 %vm92_vm0, %v198_v4  ;;  %v31_v8 = vld [vmem:[%s267_s2 + $0x8] sm:$0xff] }
   0x4   :  { %175 = vmatprep.subr.bf16.mxu0 %v193_v2  ;;  %35 = vperm.xlu0 %190, %v30_v5   ;;  %v196_v9 = vld [vmem:[%s265_s1 + $0x20] sm:$0xff]   ;;  %v197_v10 = vld [vmem:[%s265_s1 + $0x28] sm:$0xff]  }
   0x5   :  { %45 = vperm.xlu1 %191, %v32_v7   ;;  %v199_v11 = vld [vmem:[%s266_s0 + $0x8] ss:$0 sps:$4 sm:$0xff]  }
   0x7   :  { %176 = vmatpush3.bf16.msra.mxu0 %v193_v2 }
   0x8   :  { %177 = vmatprep.subr.bf16.mxu0 %v194_v3  ;;  %40 = vperm.xlu0 %190, %v31_v8  }
   0xb   :  { %178 = vmatpush3.bf16.msra.mxu0 %v194_v3 }
   0xc   :  { %179 = vmatprep.subr.bf16.mxu0 %v195_v6 }
   0xf   :  { %180 = vmatpush3.bf16.msra.mxu0 %v195_v6 }
  0x10   :  { %181 = vmatprep.subr.bf16.mxu0 %v196_v9 }
  0x13   :  { %182 = vmatpush3.bf16.msra.mxu0 %v196_v9 }
  0x14   :  { %183 = vmatprep.subr.bf16.mxu0 %v197_v10 }
  0x17   :  { %184 = vmatpush3.bf16.msra.mxu0 %v197_v10 }
  0x1a   :  { %186 = vmatmul.mubr.msk.bf16.vlgmr.msra.gmra.mrb[0].mxu0 %vm92_vm0, %v199_v11 }
  0x83   :  { %v36_v12 = vpop.permute.xlu0 %35 }
  0x84   :  { %v46_v13 = vpop.permute.xlu1 %45 }
  0x87   :  { %v41_v19 = vpop.permute.xlu0 %40 }
  0xed   :  { %v187_v14 = vpop.f32.mrb[0].mxu0 }
  0xee   :  { %v142_v15 = vadd.f32 %v187_v14, %v46_v13  ;;  %v133_v16 = vpop.f32.mrb[1].mxu0 }
  0xef   :  { %v134_v17 = vadd.f32 %v133_v16, %v36_v12  ;;  %v188_v18 = vpop.f32.mrb[2].mxu0 }
  0xf0   :  { %150 = vst.msk [vmem:[%s268_s3 + $0x10] sm:$0xff] %vm147_vm1, %v142_v15  ;;  %v136_v20 = vpop.f32.mrb[3].mxu0 }
  0xf1   :  { %148 = vst.msk [vmem:[%s268_s3] sm:$0xff] %vm147_vm1, %v134_v17  ;;  %v137_v21 = vadd.f32 %v136_v20, %v41_v19 }
  0xf3   :  { %149 = vst.msk [vmem:[%s268_s3 + $0x8] sm:$0xff] %vm147_vm1, %v137_v21 }

// kernel: riabnet_forward.27
= control target key start
LH: loop header
LB: loop body
LE: loop exit
PB: predicated region body
PF: predicated region fallthrough
CT: control target
= control target key end

     0   :  { %v241_v0 = vmov 0   ;;  %vm146_vm0 = vcmask 719872   ;;  %vm150_vm1 = vcmask 1043456   ;;  %vm197_vm2 = vcmask 408576   ;;  %s322_s1 = inlined_call_operand.vmem [shape: bf16[216,50], index: 1, kind: input, shape index: {}]   ;;  %s323_s2 = inlined_call_operand.vmem [shape: f32[12,1], index: 2, kind: input, shape index: {}]   ;;  %s324_s0 = inlined_call_operand.vmem [shape: bf16[12,216], index: 0, kind: input, shape index: {}]   ;;  %s325_s3 = inlined_call_operand.vmem [shape: f32[12,50], index: 3, kind: output, shape index: {}]  }
   0x1   :  { %154 = vmatprep.subr.bf16.mxu0 %v241_v0  ;;  %v224_v1 = vld [vmem:[%s322_s1] sm:$0xff]   ;;  %223 = vset.pattern.permute.xlu0 %v241_v0  ;;  %v225_v2 = vld [vmem:[%s322_s1 + $0x8] sm:$0xff]   ;;  %v226_v3 = vld [vmem:[%s322_s1 + $0x10] sm:$0xff]   ;;  %vm199_vm3 = vcmask 404480  }
   0x2   :  { %155 = vmatpush1.bf16.msra.mxu0 %v224_v1  ;;  %v227_v4 = vld [vmem:[%s322_s1 + $0x18] sm:$0xff]   ;;  %v228_v5 = vld [vmem:[%s322_s1 + $0x20] sm:$0xff]   ;;  %v45_v8 = vld [vmem:[%s323_s2 + $0x8] sm:$0xf] }
   0x3   :  { %156 = vmatprep.subr.bf16.mxu0 %v241_v0  ;;  %v44_v6 = vld [vmem:[%s323_s2] sm:$0xff]  ;;  %v229_v9 = vld [vmem:[%s322_s1 + $0x28] sm:$0xff]   ;;  %v230_v10 = vld [vmem:[%s322_s1 + $0x30] sm:$0xff]  }
   0x4   :  { %v240_v7 = vld [vmem:[%s324_s0 + $0x4] ss:$8 sps:$4 sm:$0x3f]   ;;  %48 = vperm.xlu0 %223, %v44_v6   ;;  %v231_v11 = vld [vmem:[%s322_s1 + $0x38] sm:$0xff]   ;;  %v234_v14 = vld [vmem:[%s322_s1 + $0x50] sm:$0xff]  }
   0x5   :  { %221 = vmatprep.mubr.msk.bf16.mxu0 %vm146_vm0, %v240_v7  ;;  %v232_v12 = vld [vmem:[%s322_s1 + $0x40] sm:$0xff]   ;;  %v233_v13 = vld [vmem:[%s322_s1 + $0x48] sm:$0xff]   ;;  %v235_v15 = vld [vmem:[%s322_s1 + $0x58] sm:$0xff]  }
   0x6   :  { %157 = vmatpush1.bf16.msra.mxu0 %v225_v2  ;;  %v236_v16 = vld [vmem:[%s322_s1 + $0x60] sm:$0xff]   ;;  %v237_v17 = vld [vmem:[%s322_s1 + $0x68] ss:$0 sps:$4 sm:$0xff]  }
   0x7   :  { %158 = vmatprep.subr.bf16.mxu0 %v241_v0  ;;  %v152_v18 = vsel %vm150_vm1, %v237_v17, 0  ;;  %v238_v19 = vld [vmem:[%s324_s0] ss:$8 sps:$4 sm:$0x3f]  }
   0x8   :  { %53 = vperm.xlu0 %223, %v45_v8  }
   0xa   :  { %159 = vmatpush1.bf16.msra.mxu0 %v226_v3 }
   0xb   :  { %160 = vmatprep.subr.bf16.mxu0 %v241_v0 }
   0xe   :  { %161 = vmatpush1.bf16.msra.mxu0 %v227_v4 }
   0xf   :  { %162 = vmatprep.subr.bf16.mxu0 %v241_v0 }
  0x12   :  { %163 = vmatpush1.bf16.msra.mxu0 %v228_v5 }
  0x13   :  { %164 = vmatprep.subr.bf16.mxu0 %v241_v0 }
  0x16   :  { %165 = vmatpush1.bf16.msra.mxu0 %v229_v9 }
  0x17   :  { %166 = vmatprep.subr.bf16.mxu0 %v241_v0 }
  0x1a   :  { %167 = vmatpush1.bf16.msra.mxu0 %v230_v10 }
  0x1b   :  { %168 = vmatprep.subr.bf16.mxu0 %v241_v0 }
  0x1e   :  { %169 = vmatpush1.bf16.msra.mxu0 %v231_v11 }
  0x1f   :  { %170 = vmatprep.subr.bf16.mxu0 %v241_v0 }
  0x22   :  { %171 = vmatpush1.bf16.msra.mxu0 %v232_v12 }
  0x23   :  { %172 = vmatprep.subr.bf16.mxu0 %v241_v0 }
  0x26   :  { %173 = vmatpush1.bf16.msra.mxu0 %v233_v13 }
  0x27   :  { %174 = vmatprep.subr.bf16.mxu0 %v241_v0 }
  0x2a   :  { %175 = vmatpush1.bf16.msra.mxu0 %v234_v14 }
  0x2b   :  { %176 = vmatprep.subr.bf16.mxu0 %v241_v0 }
  0x2e   :  { %177 = vmatpush1.bf16.msra.mxu0 %v235_v15 }
  0x2f   :  { %178 = vmatprep.subr.bf16.mxu0 %v241_v0 }
  0x32   :  { %179 = vmatpush1.bf16.msra.mxu0 %v236_v16 }
  0x33   :  { %180 = vmatprep.subr.bf16.mxu0 %v241_v0 }
  0x36   :  { %181 = vmatpush1.bf16.msra.mxu0 %v152_v18 }
  0x39   :  { %187 = vmatmul.mubr.bf16.vlgmr.msra.gmra.mrb[0].mxu0 %v238_v19 }
  0x83   :  { %v49_v20 = vpop.permute.xlu0 %48 }
  0x87   :  { %v54_v24 = vpop.permute.xlu0 %53 }
 0x10c   :  { %v188_v21 = vpop.f32.mrb[0].mxu0 }
 0x10d   :  { %v189_v22 = vadd.f32 %v188_v21, %v49_v20  ;;  %v190_v23 = vpop.f32.mrb[1].mxu0 }
 0x10e   :  { %v191_v25 = vpop.f32.mrb[2].mxu0 }
 0x10f   :  { %v195_v26 = vmax.f32 %v189_v22, 0.0  ;;  %v192_v27 = vadd.f32 %v191_v25, %v54_v24  ;;  %v193_v28 = vpop.f32.mrb[3].mxu0 }
 0x111   :  { %198 = vst.msk [vmem:[%s325_s3] sm:$0xff] %vm197_vm2, %v195_v26  ;;  %v196_v29 = vmax.f32 %v192_v27, 0.0 }
 0x113   :  { %200 = vst.msk [vmem:[%s325_s3 + $0x8] sm:$0xf] %vm199_vm3, %v196_v29 }

// kernel: riabnet_forward.28
= control target key start
LH: loop header
LB: loop body
LE: loop exit
PB: predicated region body
PF: predicated region fallthrough
CT: control target
= control target key end

     0   :  { %v204_v1 = vmov 0   ;;  %vm108_vm0 = vcmask 1045504   ;;  %vm104_vm1 = vcmask 883712   ;;  %vm159_vm2 = vcmask 275456   ;;  %s279_s1 = inlined_call_operand.vmem [shape: bf16[108,162], index: 1, kind: input, shape index: {}]   ;;  %s280_s2 = inlined_call_operand.vmem [shape: f32[6,1], index: 2, kind: input, shape index: {}]   ;;  %s281_s0 = inlined_call_operand.vmem [shape: bf16[6,108], index: 0, kind: input, shape index: {}]   ;;  %s282_s3 = inlined_call_operand.vmem [shape: f32[6,162], index: 3, kind: output, shape index: {}]  }
   0x1   :  { %v183_v0 = vld [vmem:[%s279_s1 + $0x4] ss:$8 sps:$4 sm:$0xff]   ;;  %147 = vmatprep.mubr.bf16.mxu0 %v204_v1  ;;  %182 = vset.pattern.permute.xlu0 %v204_v1  ;;  %v185_v2 = vld [vmem:[%s279_s1] ss:$8 sps:$4 sm:$0xff]   ;;  %v186_v3 = vld [vmem:[%s279_s1 + $0x14] ss:$8 sps:$4 sm:$0xff]  }
   0x2   :  { %115 = vmatprep.subr.bf16.mxu0 %v183_v0  ;;  %v188_v4 = vld [vmem:[%s279_s1 + $0x10] ss:$8 sps:$4 sm:$0xff]   ;;  %v189_v5 = vld [vmem:[%s279_s1 + $0x24] ss:$8 sps:$4 sm:$0xff]   ;;  %v191_v6 = vld [vmem:[%s279_s1 + $0x20] ss:$8 sps:$4 sm:$0xff]  }
   0x3   :  { %116 = vmatpush1.bf16.msra.mxu0 %v185_v2  ;;  %v192_v7 = vld [vmem:[%s279_s1 + $0x34] ss:$8 sps:$4 sm:$0xff]   ;;  %v30_v8 = vld [vmem:[%s280_s2] sm:$0x3f]  ;;  %v194_v9 = vld [vmem:[%s279_s1 + $0x30] ss:$8 sps:$4 sm:$0xff]  }
   0x4   :  { %117 = vmatprep.subr.bf16.mxu0 %v186_v3  ;;  %33 = vperm.xlu0 %182, %v30_v8   ;;  %v195_v10 = vld [vmem:[%s279_s1 + $0x44] ss:$8 sps:$4 sm:$0xff]   ;;  %v197_v11 = vld [vmem:[%s279_s1 + $0x40] ss:$8 sps:$4 sm:$0xff]   ;;  %v198_v12 = vld [vmem:[%s279_s1 + $0x54] ss:$8 sps:$4 sm:$0xff]  }
   0x5   :  { %v200_v13 = vld [vmem:[%s279_s1 + $0x50] ss:$8 sps:$4 sm:$0xff]   ;;  %v201_v14 = vld [vmem:[%s279_s1 + $0x64] ss:$8 sps:$4 sm:$0x3f]  }
   0x6   :  { %v203_v15 = vld [vmem:[%s279_s1 + $0x60] ss:$8 sps:$4 sm:$0x3f]  }
   0x7   :  { %118 = vmatpush1.bf16.msra.mxu0 %v188_v4  ;;  %v110_v16 = vsel %vm108_vm0, %v203_v15, 0  ;;  %v15_v17 = vld [vmem:[%s281_s0] sm:$0x7] }
   0x8   :  { %119 = vmatprep.subr.bf16.mxu0 %v189_v5 }
   0xb   :  { %120 = vmatpush1.bf16.msra.mxu0 %v191_v6 }
   0xc   :  { %121 = vmatprep.subr.bf16.mxu0 %v192_v7 }
   0xf   :  { %122 = vmatpush1.bf16.msra.mxu0 %v194_v9 }
  0x10   :  { %123 = vmatprep.subr.bf16.mxu0 %v195_v10 }
  0x13   :  { %124 = vmatpush1.bf16.msra.mxu0 %v197_v11 }
  0x14   :  { %125 = vmatprep.subr.bf16.mxu0 %v198_v12 }
  0x17   :  { %126 = vmatpush1.bf16.msra.mxu0 %v200_v13 }
  0x18   :  { %179 = vmatprep.subr.msk.bf16.mxu0 %vm108_vm0, %v201_v14 }
  0x1b   :  { %128 = vmatpush1.bf16.msra.mxu0 %v110_v16 }
  0x1e   :  { %180 = vmatmul.mubr.msk.bf16.vlgmr.msra.gmra.mrb[0].mxu0 %vm104_vm1, %v15_v17 }
  0x83   :  { %v34_v18 = vpop.permute.xlu0 %33 }
  0xf1   :  { %v149_v19 = vpop.f32.mrb[0].mxu0 }
  0xf2   :  { %v150_v20 = vadd.f32 %v149_v19, %v34_v18  ;;  %v151_v21 = vpop.f32.mrb[1].mxu0 }
  0xf3   :  { %v152_v22 = vadd.f32 %v151_v21, %v34_v18  ;;  %v153_v23 = vpop.f32.mrb[2].mxu0 }
  0xf4   :  { %v156_v24 = vmax.f32 %v150_v20, 0.0  ;;  %v154_v25 = vpop.f32.mrb[3].mxu0 }
  0xf5   :  { %v157_v26 = vmax.f32 %v152_v22, 0.0 }
  0xf6   :  { %158 = vst [vmem:[%s282_s3] sm:$0x3f] %v156_v24 }
  0xf7   :  { %160 = vst.msk [vmem:[%s282_s3 + $0x8] sm:$0x3f] %vm159_vm2, %v157_v26 }

// kernel: riabnet_forward.29
= control target key start
LH: loop header
LB: loop body
LE: loop exit
PB: predicated region body
PF: predicated region fallthrough
CT: control target
= control target key end

     0   :  { %v369_v1 = vmov 0   ;;  %vm138_vm0 = vcmask 1042432   ;;  %vm134_vm1 = vcmask 441344   ;;  %v370_v23 = vmov 0.0   ;;  %s469_s1 = inlined_call_operand.vmem [shape: bf16[54,578], index: 1, kind: input, shape index: {}]   ;;  %s470_s2 = inlined_call_operand.vmem [shape: f32[3,1], index: 2, kind: input, shape index: {}]   ;;  %s471_s0 = inlined_call_operand.vmem [shape: bf16[3,54], index: 0, kind: input, shape index: {}]   ;;  %s472_s3 = inlined_call_operand.vmem [shape: f32[3,578], index: 3, kind: output, shape index: {}]  }
   0x1   :  { %v343_v0 = vld [vmem:[%s469_s1 + $0x4] ss:$20 sps:$4 sm:$0xff]   ;;  %186 = vmatprep.mubr.bf16.mxu0 %v369_v1  ;;  %227 = vmatprep.mubr.bf16.mxu1 %v369_v1  ;;  %v345_v2 = vld [vmem:[%s469_s1] ss:$20 sps:$4 sm:$0xff]   ;;  %v348_v4 = vld [vmem:[%s469_s1 + $0x28] ss:$20 sps:$4 sm:$0xff]  }
   0x2   :  { %342 = vset.pattern.permute.xlu0 %v369_v1  ;;  %154 = vmatprep.subr.bf16.mxu0 %v343_v0  ;;  %v346_v3 = vld [vmem:[%s469_s1 + $0x2c] ss:$20 sps:$4 sm:$0xff]   ;;  %v349_v5 = vld [vmem:[%s469_s1 + $0x54] ss:$20 sps:$4 sm:$0xff]   ;;  %v34_v8 = vld [vmem:[%s469_s1 + $0x78] sm:$0x77] }
   0x3   :  { %155 = vmatpush1.bf16.msra.mxu0 %v345_v2  ;;  %v352_v6 = vld [vmem:[%s469_s1 + $0xc] ss:$20 sps:$4 sm:$0xff]   ;;  %v354_v7 = vld [vmem:[%s469_s1 + $0x8] ss:$20 sps:$4 sm:$0xff]   ;;  %v351_v9 = vld [vmem:[%s469_s1 + $0x50] ss:$20 sps:$4 sm:$0xff]   ;;  %v313_v12 = vcombine.high %v34_v8, %v34_v8  ;;  %v312_v13 = vcombine.low %v34_v8, %v34_v8 }
   0x4   :  { %156 = vmatprep.subr.bf16.mxu0 %v346_v3  ;;  %195 = vmatprep.subr.bf16.mxu1 %v352_v6  ;;  %v357_v10 = vld [vmem:[%s469_s1 + $0x34] ss:$20 sps:$4 sm:$0xff]   ;;  %v359_v11 = vld [vmem:[%s469_s1 + $0x30] ss:$20 sps:$4 sm:$0xff]   ;;  %v363_v16 = vld [vmem:[%s469_s1 + $0x58] ss:$20 sps:$4 sm:$0xff]  }
   0x5   :  { %196 = vmatpush1.bf16.msra.mxu1 %v354_v7  ;;  %v361_v14 = vld [vmem:[%s469_s1 + $0x5c] ss:$20 sps:$4 sm:$0xff]   ;;  %v35_v15 = vld [vmem:[%s469_s1 + $0x80] sm:$0x77]  ;;  %v140_v17 = vsel %vm138_vm0, %v312_v13, 0  ;;  %vm371_vm2 = vmmov 0  }
   0x6   :  { %197 = vmatprep.subr.bf16.mxu1 %v357_v10  ;;  %v315_v18 = vcombine.high %v35_v15, %v35_v15  ;;  %v314_v19 = vcombine.low %v35_v15, %v35_v15  ;;  %v37_v20 = vld [vmem:[%s470_s2] sm:$0x7]  ;;  %v360_v22 = vld [vmem:[%s469_s1 + $0x10] ss:$20 sps:$4 sm:$0xff]   ;;  %v364_v25 = vld [vmem:[%s469_s1 + $0x38] ss:$20 sps:$4 sm:$0xff]  }
   0x7   :  { %157 = vmatpush1.bf16.msra.mxu0 %v348_v4  ;;  %40 = vperm.xlu0 %342, %v37_v20   ;;  %v15_v21 = vld [vmem:[%s471_s0] sm:$0x3]  ;;  %v368_v27 = vld [vmem:[%s469_s1 + $0x88] ss:$0 sps:$4 sm:$0x77]   ;;  %vm291_vm3 = vcmask 534528  }
   0x8   :  { %158 = vmatprep.subr.bf16.mxu0 %v349_v5  ;;  %v146_v24 = vsel %vm138_vm0, %v314_v19, 0  ;;  %v367_v26 = vld [vmem:[%s469_s1 + $0x60] ss:$20 sps:$4 sm:$0xff]   ;;  %v152_v28 = vsel %vm138_vm0, %v368_v27, 0 }
   0x9   :  { %198 = vmatpush1.bf16.msra.mxu1 %v359_v11 }
   0xa   :  { %199 = vmatprep.subr.bf16.mxu1 %v361_v14 }
   0xb   :  { %159 = vmatpush1.bf16.msra.mxu0 %v351_v9 }
   0xc   :  { %317 = vmatprep.subr.msk.bf16.mxu0 %vm138_vm0, %v313_v12 }
   0xd   :  { %200 = vmatpush1.bf16.msra.mxu1 %v363_v16 }
   0xe   :  { %319 = vmatprep.subr.msk.bf16.mxu1 %vm138_vm0, %v315_v18 }
   0xf   :  { %161 = vmatpush1.bf16.msra.mxu0 %v140_v17 }
  0x10   :  { %327 = vmatprep.subr.bf16.mxu0 %v370_v23 }
  0x11   :  { %202 = vmatpush1.bf16.msra.mxu1 %v146_v24 }
  0x12   :  { %318 = vmatmul.mubr.msk.bf16.vlgmr.msra.gmra.mrb[0].mxu0 %vm134_vm1, %v15_v21 }
  0x13   :  { %328 = vmatpush3.bf16.msra.mxu0 %v360_v22  ;;  %335 = vmatprep.mubr.msk.bf16.mxu0 %vm371_vm2, %v370_v23 }
  0x14   :  { %329 = vmatprep.subr.bf16.mxu0 %v370_v23  ;;  %320 = vmatmul.mubr.msk.bf16.vlgmr.msra.gmra.mrb[0].mxu1 %vm134_vm1, %v15_v21 }
  0x17   :  { %330 = vmatpush3.bf16.msra.mxu0 %v364_v25 }
  0x18   :  { %331 = vmatprep.subr.bf16.mxu0 %v370_v23 }
  0x1b   :  { %332 = vmatpush3.bf16.msra.mxu0 %v367_v26 }
  0x1c   :  { %333 = vmatprep.subr.bf16.mxu0 %v370_v23 }
  0x1f   :  { %334 = vmatpush3.bf16.msra.mxu0 %v152_v28 }
  0x22   :  { %336 = vmatmul.mubr.msk.bf16.vlgmr.msra.gmra.mrb[4].mxu0 %vm134_vm1, %v15_v21 }
  0x86   :  { %v41_v29 = vpop.permute.xlu0 %40 }
  0xe5   :  { %v188_v30 = vpop.f32.mrb[0].mxu0 }
  0xe6   :  { %v189_v31 = vadd.f32 %v188_v30, %v41_v29  ;;  %v190_v32 = vpop.f32.mrb[1].mxu0 }
  0xe7   :  { %v191_v33 = vadd.f32 %v190_v32, %v41_v29  ;;  %v192_v34 = vpop.f32.mrb[2].mxu0  ;;  %v229_v38 = vpop.f32.mrb[0].mxu1 }
  0xe8   :  { %v276_v35 = vmax.f32 %v189_v31, 0.0  ;;  %v193_v36 = vpop.f32.mrb[3].mxu0  ;;  %v230_v39 = vadd.f32 %v229_v38, %v41_v29  ;;  %v231_v40 = vpop.f32.mrb[1].mxu1 }
  0xe9   :  { %v277_v37 = vmax.f32 %v191_v33, 0.0  ;;  %v232_v42 = vadd.f32 %v231_v40, %v41_v29  ;;  %v233_v43 = vpop.f32.mrb[2].mxu1 }
  0xea   :  { %v278_v44 = vmax.f32 %v230_v39, 0.0  ;;  %v234_v45 = vpop.f32.mrb[3].mxu1 }
  0xeb   :  { %v285_v41 = vcombine.low %v276_v35, %v277_v37  ;;  %v279_v46 = vmax.f32 %v232_v42, 0.0 }
  0xed   :  { %289 = vst [vmem:[%s472_s3] sm:$0x77] %v285_v41  ;;  %v286_v47 = vcombine.low %v278_v44, %v279_v46 }
  0xef   :  { %290 = vst [vmem:[%s472_s3 + $0x8] sm:$0x77] %v286_v47 }
  0xf5   :  { %v270_v48 = vpop.f32.mrb[4].mxu0 }
  0xf6   :  { %v271_v49 = vadd.f32 %v270_v48, %v41_v29  ;;  %v337_v50 = vpop.f32.mrb[5].mxu0 }
  0xf7   :  { %v273_v51 = vpop.f32.mrb[6].mxu0 }
  0xf8   :  { %v280_v52 = vmax.f32 %v271_v49, 0.0  ;;  %v338_v53 = vpop.f32.mrb[7].mxu0 }
  0xfa   :  { %292 = vst.msk [vmem:[%s472_s3 + $0x10] sm:$0x7] %vm291_vm3, %v280_v52 }

</bundles_post_ra>
